<compile_context>
chip_gen: v7x
topology: tpu7x:2x2x1
jax: 0.10.0
libtpu: 0.0.40
codegen_flags: <defaults>
</compile_context>

<pallas_src>
import jax
import jax.numpy as jnp
from jax.experimental import pallas as pl
from jax.experimental.pallas import tpu as pltpu


def _silu(x):
    # x * sigmoid(x): logistic lowers to the EUP, freeing the VALU.
    return x * jax.nn.sigmoid(x)


def _round_up(x, m):
    return (x + m - 1) // m * m


def _vmem_bytes(shape, dtype):
    """Physical VMEM bytes of a 2-D block incl. lane/sublane padding."""
    item = jnp.dtype(dtype).itemsize
    sub = max(8, 32 // item)                 # f32 -> 8, bf16 -> 16, i8 -> 32
    r = _round_up(int(shape[0]), sub)
    c = _round_up(int(shape[1]), 128)
    return r * c * item


# --------------------------------------------------------------------------- #
# Kernel A: per-edge MLP -> transT_aug (raw_dim+1, E) bf16
# --------------------------------------------------------------------------- #
def edge_mlp_kernel(xin_ref, cdT_ref, w1_ref, b1_ref, w2_ref, b2_ref,
                    tw1_ref, tb1_ref, tw2_ref, tb2_ref, tw3t_ref, out_ref):
    # msg_mlp: Linear(raw_dim+1 -> hid) (sqr_dist packed as last input column),
    # SiLU, Linear(hid -> hid), SiLU.  bf16 x bf16 MXU, f32 accumulation.
    h = _silu(jnp.dot(xin_ref[...], w1_ref[...],
                      preferred_element_type=jnp.float32) + b1_ref[...])
    msg = _silu(jnp.dot(h.astype(jnp.bfloat16), w2_ref[...],
                        preferred_element_type=jnp.float32) + b2_ref[...])

    # trans_mlp: Linear, SiLU, Linear, SiLU, Linear(hid -> 1, no bias).
    t = _silu(jnp.dot(msg.astype(jnp.bfloat16), tw1_ref[...],
                      preferred_element_type=jnp.float32) + tb1_ref[...])
    t = _silu(jnp.dot(t.astype(jnp.bfloat16), tw2_ref[...],
                      preferred_element_type=jnp.float32) + tb2_ref[...])
    # Final hid->1 projection computed directly in the lane-dense (1, TE)
    # orientation: tw3_row @ t^T.
    scaleT = jax.lax.dot_general(tw3t_ref[...], t,
                                 dimension_numbers=(((1,), (1,)), ((), ())),
                                 preferred_element_type=jnp.float32)   # (1, TE)

    # rows 0..D-1: coord_diff^T * scale ; row D: ones (count source).
    # cdT_ref already carries a zero last row, so the "+ mask" fills it with 1.
    d1 = out_ref.shape[0]
    ones_mask = (jax.lax.broadcasted_iota(jnp.int32, (d1, 1), 0)
                 == d1 - 1).astype(jnp.float32)                        # (D+1, 1)
    out_ref[...] = (cdT_ref[...] * scaleT + ones_mask).astype(jnp.bfloat16)


# --------------------------------------------------------------------------- #
# Kernel B: scatter-mean over `row` via a bf16 one-hot MXU matmul
# --------------------------------------------------------------------------- #
def scatter_mean_kernel(row_ref, tT_ref, out_ref, acc_ref):
    n = pl.program_id(0)          # node tile (parallel)
    e = pl.program_id(1)          # edge tile (reduction, innermost)

    @pl.when(e == 0)
    def _init():
        acc_ref[...] = jnp.zeros_like(acc_ref)

    tile_e = row_ref.shape[0]
    tile_n = acc_ref.shape[1]
    # Local comparison: shift the (TE,1) ids instead of adding n*tile_n to the
    # full (TE,TN) iota.  Sentinel row id (= n_pad) never matches any lane.
    row_local = row_ref[...] - n * tile_n                              # (TE, 1)
    ids = jax.lax.broadcasted_iota(jnp.int32, (tile_e, tile_n), 1)
    onehot = (ids == row_local).astype(jnp.bfloat16)                   # exact 0/1
    acc_ref[...] += jnp.dot(tT_ref[...], onehot,
                            preferred_element_type=jnp.float32)        # (D+1, TN)

    @pl.when(e == pl.num_programs(1) - 1)
    def _finalize():
        a = acc_ref[...]
        d = a.shape[0] - 1
        cnt = jnp.maximum(a[d:, :], 1.0)                               # (1, TN)
        out_ref[...] = a[:d, :] * pl.reciprocal(cnt, approx=True)


# --------------------------------------------------------------------------- #
# Wrapper
# --------------------------------------------------------------------------- #
def clsf_forward(edge_index, neighbor, qry_embeds, proto_embeds, params,
                 tile_e_max=512, tile_n_max=1024):
    """Replicates clsf_module.forward; returns (neighbor, updated qry_embeds)."""
    raw_dim = qry_embeds.shape[1]
    hid_dim = params["w2"].shape[0]
    n_proto = proto_embeds.shape[0]

    x = jnp.concatenate([proto_embeds, qry_embeds], axis=0)            # (N, D)
    x_neighbor = jnp.concatenate([proto_embeds, neighbor], axis=0)     # (N, D)
    row = edge_index[0].astype(jnp.int32)
    col = edge_index[1].astype(jnp.int32)
    N = x.shape[0]
    E = row.shape[0]

    if E == 0:                    # matches reference: zero trans, clamped counts
        return neighbor, qry_embeds

    # ---- glue (cheap, fuses with the gathers in XLA) ------------------------
    coord_diff = x[row] - x[col]                                       # (E, D)
    sqr_dist = jnp.sum(coord_diff * coord_diff, axis=1, keepdims=True) # (E, 1)
    xin = jnp.concatenate([x_neighbor[col], sqr_dist],
                          axis=1).astype(jnp.bfloat16)                 # (E, D+1)
    cdT_aug = jnp.concatenate([coord_diff.T,
                               jnp.zeros((1, E), jnp.float32)], axis=0)  # (D+1, E)

    # ---- tiling / padding ----------------------------------------------------
    if E <= tile_e_max:
        tile_e = _round_up(E, 128)
        e_pad = tile_e
    else:
        tile_e = tile_e_max
        e_pad = _round_up(E, tile_e)
    pe = e_pad - E

    n_pad = _round_up(N, 128)
    if n_pad > tile_n_max:
        tile_n = tile_n_max
        n_pad = _round_up(n_pad, tile_n)
    elif n_pad >= 256:
        # present >= 2 node tiles so both v7x TensorCores get scatter work
        tile_n = _round_up(n_pad // 2, 128)
        n_pad = _round_up(n_pad, tile_n)
    else:
        tile_n = n_pad

    xin_p = jnp.pad(xin, ((0, pe), (0, 0)))
    cdT_p = jnp.pad(cdT_aug, ((0, 0), (0, pe)))
    # sentinel row id == n_pad -> all-zero one-hot column for padded edges
    row_p = jnp.pad(row, (0, pe), constant_values=n_pad).reshape(e_pad, 1)

    d1 = raw_dim + 1
    wmapA = lambda e: (0, 0)

    # ---- Kernel A: edge MLP --------------------------------------------------
    vmem_a = 2 * (_vmem_bytes((tile_e, d1), jnp.bfloat16)
                  + _vmem_bytes((d1, tile_e), jnp.float32)
                  + _vmem_bytes((d1, tile_e), jnp.bfloat16)
                  + _vmem_bytes((d1, hid_dim), jnp.bfloat16)
                  + 3 * _vmem_bytes((hid_dim, hid_dim), jnp.bfloat16)
                  + 5 * _vmem_bytes((1, hid_dim), jnp.float32))
    vmem_a += 8 * _vmem_bytes((tile_e, hid_dim), jnp.float32)   # MLP temps
    vmem_a = int(min(max(2 * vmem_a, 8 << 20), 40 << 20))

    cost_a = pl.CostEstimate(
        flops=int(2 * e_pad * (d1 * hid_dim + 3 * hid_dim * hid_dim + hid_dim)
                  + 2 * d1 * e_pad),
        transcendentals=int(4 * e_pad * hid_dim),
        bytes_accessed=int(e_pad * d1 * 2 + d1 * e_pad * 4 + d1 * e_pad * 2
                           + 2 * (3 * hid_dim * hid_dim + d1 * hid_dim)
                           + 5 * hid_dim * 4))

    transT_aug = pl.pallas_call(
        edge_mlp_kernel,
        out_shape=jax.ShapeDtypeStruct((d1, e_pad), jnp.bfloat16),
        grid_spec=pltpu.PrefetchScalarGridSpec(
            num_scalar_prefetch=0,
            grid=(e_pad // tile_e,),
            in_specs=[
                pl.BlockSpec((tile_e, d1), lambda e: (e, 0)),      # [xn | sqr_dist]
                pl.BlockSpec((d1, tile_e), lambda e: (0, e)),      # coord_diff^T (+0 row)
                pl.BlockSpec((d1, hid_dim), wmapA),                # w1  (bf16)
                pl.BlockSpec((1, hid_dim), wmapA),                 # b1
                pl.BlockSpec((hid_dim, hid_dim), wmapA),           # w2  (bf16)
                pl.BlockSpec((1, hid_dim), wmapA),                 # b2
                pl.BlockSpec((hid_dim, hid_dim), wmapA),           # tw1 (bf16)
                pl.BlockSpec((1, hid_dim), wmapA),                 # tb1
                pl.BlockSpec((hid_dim, hid_dim), wmapA),           # tw2 (bf16)
                pl.BlockSpec((1, hid_dim), wmapA),                 # tb2
                pl.BlockSpec((1, hid_dim), wmapA),                 # tw3^T
            ],
            out_specs=pl.BlockSpec((d1, tile_e), lambda e: (0, e)),
        ),
        compiler_params=pltpu.CompilerParams(
            dimension_semantics=("parallel",),
            vmem_limit_bytes=vmem_a),
        cost_estimate=cost_a,
    )(xin_p, cdT_p,
      params["w1"].astype(jnp.bfloat16), params["b1"],
      params["w2"].astype(jnp.bfloat16), params["b2"],
      params["tw1"].astype(jnp.bfloat16), params["tb1"],
      params["tw2"].astype(jnp.bfloat16), params["tb2"],
      params["tw3"].reshape(1, hid_dim))

    # ---- Kernel B: scatter-mean over row ------------------------------------
    vmem_b = 2 * (_vmem_bytes((tile_e, 1), jnp.int32)
                  + _vmem_bytes((d1, tile_e), jnp.bfloat16)
                  + _vmem_bytes((raw_dim, tile_n), jnp.float32))
    vmem_b += _vmem_bytes((d1, tile_n), jnp.float32)        # accumulator scratch
    vmem_b += _vmem_bytes((tile_e, tile_n), jnp.int32)      # iota / compare temp
    vmem_b += _vmem_bytes((tile_e, tile_n), jnp.bfloat16)   # one-hot
    vmem_b = int(min(max(2 * vmem_b, 8 << 20), 40 << 20))

    n_tiles_n = n_pad // tile_n
    cost_b = pl.CostEstimate(
        flops=int(2 * d1 * e_pad * n_pad + e_pad * n_pad),
        transcendentals=0,
        bytes_accessed=int(n_tiles_n * e_pad * (d1 * 2 + 4)
                           + raw_dim * n_pad * 4))

    out_t = pl.pallas_call(
        scatter_mean_kernel,
        out_shape=jax.ShapeDtypeStruct((raw_dim, n_pad), jnp.float32),
        grid_spec=pltpu.PrefetchScalarGridSpec(
            num_scalar_prefetch=0,
            grid=(n_tiles_n, e_pad // tile_e),
            in_specs=[
                pl.BlockSpec((tile_e, 1), lambda n, e: (e, 0)),    # row ids
                pl.BlockSpec((d1, tile_e), lambda n, e: (0, e)),   # transT_aug
            ],
            out_specs=pl.BlockSpec((raw_dim, tile_n), lambda n, e: (0, n)),
            scratch_shapes=[pltpu.VMEM((d1, tile_n), jnp.float32)]),
        compiler_params=pltpu.CompilerParams(
            dimension_semantics=("parallel", "arbitrary"),
            vmem_limit_bytes=vmem_b),
        cost_estimate=cost_b,
    )(row_p, transT_aug)

    trans_q = out_t[:, n_proto:N].T                                    # (n_qry, D)
    qry_out = qry_embeds + trans_q
    return neighbor, qry_out


# --------------------------------------------------------------------------- #
# Parameter init mirroring the PyTorch module
# --------------------------------------------------------------------------- #
def _init_linear(key, in_dim, out_dim):
    kw, kb = jax.random.split(key)
    bound = 1.0 / jnp.sqrt(jnp.float32(in_dim))
    w = jax.random.uniform(kw, (in_dim, out_dim), jnp.float32, -bound, bound)
    b = jax.random.uniform(kb, (1, out_dim), jnp.float32, -bound, bound)
    return w, b


def make_params(raw_dim, hid_dim, key):
    keys = jax.random.split(key, 6)
    w1, b1 = _init_linear(keys[0], raw_dim + 1, hid_dim)   # msg_mlp layer 1
    w2, b2 = _init_linear(keys[1], hid_dim, hid_dim)       # msg_mlp layer 2
    tw1, tb1 = _init_linear(keys[2], hid_dim, hid_dim)     # trans_mlp layer 1
    tw2, tb2 = _init_linear(keys[3], hid_dim, hid_dim)     # trans_mlp layer 2
    # linear_xavier: Linear(hid_dim, 1, bias=False), xavier_uniform gain=0.001
    xb = 0.001 * jnp.sqrt(6.0 / (hid_dim + 1))
    tw3 = jax.random.uniform(keys[4], (hid_dim, 1), jnp.float32, -xb, xb)
    return {"w1": w1, "b1": b1, "w2": w2, "b2": b2,
            "tw1": tw1, "tb1": tb1, "tw2": tw2, "tb2": tb2, "tw3": tw3}


def _ref_forward(edge_index, neighbor, qry_embeds, proto_embeds, params):
    # pure-JAX f32 reference mirroring the PyTorch module
    x = jnp.concatenate([proto_embeds, qry_embeds], axis=0)
    xn = jnp.concatenate([proto_embeds, neighbor], axis=0)
    row, col = edge_index[0], edge_index[1]
    cd = x[row] - x[col]
    sq = jnp.sum(cd ** 2, axis=1, keepdims=True)
    inp = jnp.concatenate([xn[col], sq], axis=1)
    h = jax.nn.silu(inp @ params["w1"] + params["b1"])
    msg = jax.nn.silu(h @ params["w2"] + params["b2"])
    t = jax.nn.silu(msg @ params["tw1"] + params["tb1"])
    t = jax.nn.silu(t @ params["tw2"] + params["tb2"])
    trans = cd * (t @ params["tw3"])
    N = x.shape[0]
    sums = jax.ops.segment_sum(trans, row, num_segments=N)
    cnts = jax.ops.segment_sum(jnp.ones_like(trans), row, num_segments=N)
    trans_mean = sums / jnp.maximum(cnts, 1.0)
    return neighbor, qry_embeds + trans_mean[proto_embeds.shape[0]:]


if __name__ == "__main__":
    raw_dim, hid_dim = 8, 32
    n_proto, n_qry = 3, 5
    N = n_proto + n_qry
    E = 16

    key = jax.random.PRNGKey(0)
    k_p, k_q, k_n, k_e1, k_e2, k_w = jax.random.split(key, 6)

    proto_embeds = jax.random.normal(k_p, (n_proto, raw_dim), jnp.float32)
    qry_embeds = jax.random.normal(k_q, (n_qry, raw_dim), jnp.float32)
    neighbor = jax.random.normal(k_n, (n_qry, raw_dim), jnp.float32)
    row = jax.random.randint(k_e1, (E,), 0, N, jnp.int32)
    col = jax.random.randint(k_e2, (E,), 0, N, jnp.int32)
    edge_index = jnp.stack([row, col], axis=0)

    params = make_params(raw_dim, hid_dim, k_w)

    fwd = jax.jit(clsf_forward)
    nb_out, qry_out = fwd(edge_index, neighbor, qry_embeds, proto_embeds, params)
    jax.block_until_ready(qry_out)

    _, qry_ref = _ref_forward(edge_index, neighbor, qry_embeds,
                              proto_embeds, params)
    # bf16 MXU layers inside the kernel (including the first layer and the
    # scatter) -> compare against the f32 reference with a tolerance well below
    # the signal magnitude but above bf16-induced error.
    assert jnp.allclose(qry_out, qry_ref, atol=5e-3, rtol=1e-2), \
        "mismatch vs reference"
    assert jnp.allclose(nb_out, neighbor), "neighbor passthrough mismatch"

    print("KERNEL_OK")
</pallas_src>

<mosaic_0001>
module attributes {stable_mosaic.version = 11 : i64} {
  func.func @edge_mlp_kernel(%arg0: i32, %arg1: memref<128x9xbf16, #tpu.memory_space<vmem>>, %arg2: memref<9x128xf32, #tpu.memory_space<vmem>>, %arg3: memref<9x32xbf16, #tpu.memory_space<vmem>>, %arg4: memref<1x32xf32, #tpu.memory_space<vmem>>, %arg5: memref<32x32xbf16, #tpu.memory_space<vmem>>, %arg6: memref<1x32xf32, #tpu.memory_space<vmem>>, %arg7: memref<32x32xbf16, #tpu.memory_space<vmem>>, %arg8: memref<1x32xf32, #tpu.memory_space<vmem>>, %arg9: memref<32x32xbf16, #tpu.memory_space<vmem>>, %arg10: memref<1x32xf32, #tpu.memory_space<vmem>>, %arg11: memref<1x32xf32, #tpu.memory_space<vmem>>, %arg12: memref<9x128xbf16, #tpu.memory_space<vmem>>) attributes {dimension_semantics = [#tpu.dimension_semantics<parallel>], iteration_bounds = array<i64: 1>, scalar_prefetch = 0 : i64, scratch_operands = 0 : i64, tpu.core_type = #tpu.core_type<tc>, window_params = [{transform_indices = @transform_0, window_bounds = array<i64: 128, 9>}, {transform_indices = @transform_1, window_bounds = array<i64: 9, 128>}, {pipeline_mode = #tpu.pipeline_mode<synchronous>, transform_indices = @transform_2, window_bounds = array<i64: 9, 32>}, {pipeline_mode = #tpu.pipeline_mode<synchronous>, transform_indices = @transform_3, window_bounds = array<i64: 1, 32>}, {pipeline_mode = #tpu.pipeline_mode<synchronous>, transform_indices = @transform_4, window_bounds = array<i64: 32, 32>}, {pipeline_mode = #tpu.pipeline_mode<synchronous>, transform_indices = @transform_5, window_bounds = array<i64: 1, 32>}, {pipeline_mode = #tpu.pipeline_mode<synchronous>, transform_indices = @transform_6, window_bounds = array<i64: 32, 32>}, {pipeline_mode = #tpu.pipeline_mode<synchronous>, transform_indices = @transform_7, window_bounds = array<i64: 1, 32>}, {pipeline_mode = #tpu.pipeline_mode<synchronous>, transform_indices = @transform_8, window_bounds = array<i64: 32, 32>}, {pipeline_mode = #tpu.pipeline_mode<synchronous>, transform_indices = @transform_9, window_bounds = array<i64: 1, 32>}, {pipeline_mode = #tpu.pipeline_mode<synchronous>, transform_indices = @transform_10, window_bounds = array<i64: 1, 32>}, {transform_indices = @transform_11, window_bounds = array<i64: 9, 128>}]} {
    %c0 = arith.constant 0 : index
    %c0_0 = arith.constant 0 : index
    %0 = vector.load %arg1[%c0, %c0_0] : memref<128x9xbf16, #tpu.memory_space<vmem>>, vector<128x9xbf16>
    %c0_1 = arith.constant 0 : index
    %c0_2 = arith.constant 0 : index
    %1 = vector.load %arg3[%c0_1, %c0_2] : memref<9x32xbf16, #tpu.memory_space<vmem>>, vector<9x32xbf16>
    %cst = arith.constant dense<0.000000e+00> : vector<128x32xf32>
    %2 = tpu.matmul %0, %1, %cst {dimension_numbers = #tpu.dot_dimension_numbers<[1], [0], [0], [1], [0, 0, 1, 1], [], []>} : vector<128x9xbf16>, vector<9x32xbf16>, vector<128x32xf32> -> vector<128x32xf32>
    %c0_3 = arith.constant 0 : index
    %c0_4 = arith.constant 0 : index
    %3 = vector.load %arg4[%c0_3, %c0_4] : memref<1x32xf32, #tpu.memory_space<vmem>>, vector<1x32xf32>
    %4 = vector.broadcast %3 : vector<1x32xf32> to vector<128x32xf32>
    %5 = arith.addf %2, %4 : vector<128x32xf32>
    %6 = arith.negf %5 : vector<128x32xf32>
    %7 = math.exp %6 : vector<128x32xf32>
    %cst_5 = arith.constant 1.000000e+00 : f32
    %8 = vector.broadcast %cst_5 : f32 to vector<128x32xf32>
    %9 = arith.addf %8, %7 : vector<128x32xf32>
    %10 = arith.divf %8, %9 : vector<128x32xf32>
    %11 = arith.mulf %5, %10 : vector<128x32xf32>
    %12 = arith.truncf %11 : vector<128x32xf32> to vector<128x32xbf16>
    %c0_6 = arith.constant 0 : index
    %c0_7 = arith.constant 0 : index
    %13 = vector.load %arg5[%c0_6, %c0_7] : memref<32x32xbf16, #tpu.memory_space<vmem>>, vector<32x32xbf16>
    %cst_8 = arith.constant dense<0.000000e+00> : vector<128x32xf32>
    %14 = tpu.matmul %12, %13, %cst_8 {dimension_numbers = #tpu.dot_dimension_numbers<[1], [0], [0], [1], [0, 0, 1, 1], [], []>} : vector<128x32xbf16>, vector<32x32xbf16>, vector<128x32xf32> -> vector<128x32xf32>
    %c0_9 = arith.constant 0 : index
    %c0_10 = arith.constant 0 : index
    %15 = vector.load %arg6[%c0_9, %c0_10] : memref<1x32xf32, #tpu.memory_space<vmem>>, vector<1x32xf32>
    %16 = vector.broadcast %15 : vector<1x32xf32> to vector<128x32xf32>
    %17 = arith.addf %14, %16 : vector<128x32xf32>
    %18 = arith.negf %17 : vector<128x32xf32>
    %19 = math.exp %18 : vector<128x32xf32>
    %cst_11 = arith.constant 1.000000e+00 : f32
    %20 = vector.broadcast %cst_11 : f32 to vector<128x32xf32>
    %21 = arith.addf %20, %19 : vector<128x32xf32>
    %22 = arith.divf %20, %21 : vector<128x32xf32>
    %23 = arith.mulf %17, %22 : vector<128x32xf32>
    %24 = arith.truncf %23 : vector<128x32xf32> to vector<128x32xbf16>
    %c0_12 = arith.constant 0 : index
    %c0_13 = arith.constant 0 : index
    %25 = vector.load %arg7[%c0_12, %c0_13] : memref<32x32xbf16, #tpu.memory_space<vmem>>, vector<32x32xbf16>
    %cst_14 = arith.constant dense<0.000000e+00> : vector<128x32xf32>
    %26 = tpu.matmul %24, %25, %cst_14 {dimension_numbers = #tpu.dot_dimension_numbers<[1], [0], [0], [1], [0, 0, 1, 1], [], []>} : vector<128x32xbf16>, vector<32x32xbf16>, vector<128x32xf32> -> vector<128x32xf32>
    %c0_15 = arith.constant 0 : index
    %c0_16 = arith.constant 0 : index
    %27 = vector.load %arg8[%c0_15, %c0_16] : memref<1x32xf32, #tpu.memory_space<vmem>>, vector<1x32xf32>
    %28 = vector.broadcast %27 : vector<1x32xf32> to vector<128x32xf32>
    %29 = arith.addf %26, %28 : vector<128x32xf32>
    %30 = arith.negf %29 : vector<128x32xf32>
    %31 = math.exp %30 : vector<128x32xf32>
    %cst_17 = arith.constant 1.000000e+00 : f32
    %32 = vector.broadcast %cst_17 : f32 to vector<128x32xf32>
    %33 = arith.addf %32, %31 : vector<128x32xf32>
    %34 = arith.divf %32, %33 : vector<128x32xf32>
    %35 = arith.mulf %29, %34 : vector<128x32xf32>
    %36 = arith.truncf %35 : vector<128x32xf32> to vector<128x32xbf16>
    %c0_18 = arith.constant 0 : index
    %c0_19 = arith.constant 0 : index
    %37 = vector.load %arg9[%c0_18, %c0_19] : memref<32x32xbf16, #tpu.memory_space<vmem>>, vector<32x32xbf16>
    %cst_20 = arith.constant dense<0.000000e+00> : vector<128x32xf32>
    %38 = tpu.matmul %36, %37, %cst_20 {dimension_numbers = #tpu.dot_dimension_numbers<[1], [0], [0], [1], [0, 0, 1, 1], [], []>} : vector<128x32xbf16>, vector<32x32xbf16>, vector<128x32xf32> -> vector<128x32xf32>
    %c0_21 = arith.constant 0 : index
    %c0_22 = arith.constant 0 : index
    %39 = vector.load %arg10[%c0_21, %c0_22] : memref<1x32xf32, #tpu.memory_space<vmem>>, vector<1x32xf32>
    %40 = vector.broadcast %39 : vector<1x32xf32> to vector<128x32xf32>
    %41 = arith.addf %38, %40 : vector<128x32xf32>
    %42 = arith.negf %41 : vector<128x32xf32>
    %43 = math.exp %42 : vector<128x32xf32>
    %cst_23 = arith.constant 1.000000e+00 : f32
    %44 = vector.broadcast %cst_23 : f32 to vector<128x32xf32>
    %45 = arith.addf %44, %43 : vector<128x32xf32>
    %46 = arith.divf %44, %45 : vector<128x32xf32>
    %47 = arith.mulf %41, %46 : vector<128x32xf32>
    %c0_24 = arith.constant 0 : index
    %c0_25 = arith.constant 0 : index
    %48 = vector.load %arg11[%c0_24, %c0_25] : memref<1x32xf32, #tpu.memory_space<vmem>>, vector<1x32xf32>
    %cst_26 = arith.constant dense<0.000000e+00> : vector<1x128xf32>
    %49 = tpu.matmul %48, %47, %cst_26 {dimension_numbers = #tpu.dot_dimension_numbers<[1], [1], [0], [0], [0, 0, 1, 0], [], []>} : vector<1x32xf32>, vector<128x32xf32>, vector<1x128xf32> -> vector<1x128xf32>
    %50 = tpu.iota {dimensions = array<i32: 0>} : vector<9x1xi32>
    %c8_i32 = arith.constant 8 : i32
    %51 = vector.broadcast %c8_i32 : i32 to vector<9x1xi32>
    %52 = arith.cmpi eq, %50, %51 : vector<9x1xi32>
    %53 = arith.extui %52 : vector<9x1xi1> to vector<9x1xi32>
    %54 = arith.sitofp %53 : vector<9x1xi32> to vector<9x1xf32>
    %c0_27 = arith.constant 0 : index
    %c0_28 = arith.constant 0 : index
    %55 = vector.load %arg2[%c0_27, %c0_28] : memref<9x128xf32, #tpu.memory_space<vmem>>, vector<9x128xf32>
    %56 = vector.broadcast %49 : vector<1x128xf32> to vector<9x128xf32>
    %57 = arith.mulf %55, %56 : vector<9x128xf32>
    %58 = vector.broadcast %54 : vector<9x1xf32> to vector<9x128xf32>
    %59 = arith.addf %57, %58 : vector<9x128xf32>
    %60 = arith.truncf %59 : vector<9x128xf32> to vector<9x128xbf16>
    %c0_29 = arith.constant 0 : index
    %c0_30 = arith.constant 0 : index
    %61 = vector.load %arg12[%c0_29, %c0_30] : memref<9x128xbf16, #tpu.memory_space<vmem>>, vector<9x128xbf16>
    tpu.vector_store %arg12[%c0_29, %c0_30], %60 {strides = array<i32>} : memref<9x128xbf16, #tpu.memory_space<vmem>>, vector<9x128xbf16>,
    return
  }
  func.func @transform_0(%arg0: i32) -> (i32, i32) {
    %c0_i32 = arith.constant 0 : i32
    %c0_i32_0 = arith.constant 0 : i32
    return %arg0, %c0_i32 : i32, i32
  }
  func.func @transform_1(%arg0: i32) -> (i32, i32) {
    %c0_i32 = arith.constant 0 : i32
    %c0_i32_0 = arith.constant 0 : i32
    return %c0_i32, %arg0 : i32, i32
  }
  func.func @transform_2(%arg0: i32) -> (i32, i32) {
    %c0_i32 = arith.constant 0 : i32
    %c0_i32_0 = arith.constant 0 : i32
    %c0_i32_1 = arith.constant 0 : i32
    return %c0_i32, %c0_i32_0 : i32, i32
  }
  func.func @transform_3(%arg0: i32) -> (i32, i32) {
    %c0_i32 = arith.constant 0 : i32
    %c0_i32_0 = arith.constant 0 : i32
    %c0_i32_1 = arith.constant 0 : i32
    return %c0_i32, %c0_i32_0 : i32, i32
  }
  func.func @transform_4(%arg0: i32) -> (i32, i32) {
    %c0_i32 = arith.constant 0 : i32
    %c0_i32_0 = arith.constant 0 : i32
    %c0_i32_1 = arith.constant 0 : i32
    return %c0_i32, %c0_i32_0 : i32, i32
  }
  func.func @transform_5(%arg0: i32) -> (i32, i32) {
    %c0_i32 = arith.constant 0 : i32
    %c0_i32_0 = arith.constant 0 : i32
    %c0_i32_1 = arith.constant 0 : i32
    return %c0_i32, %c0_i32_0 : i32, i32
  }
  func.func @transform_6(%arg0: i32) -> (i32, i32) {
    %c0_i32 = arith.constant 0 : i32
    %c0_i32_0 = arith.constant 0 : i32
    %c0_i32_1 = arith.constant 0 : i32
    return %c0_i32, %c0_i32_0 : i32, i32
  }
  func.func @transform_7(%arg0: i32) -> (i32, i32) {
    %c0_i32 = arith.constant 0 : i32
    %c0_i32_0 = arith.constant 0 : i32
    %c0_i32_1 = arith.constant 0 : i32
    return %c0_i32, %c0_i32_0 : i32, i32
  }
  func.func @transform_8(%arg0: i32) -> (i32, i32) {
    %c0_i32 = arith.constant 0 : i32
    %c0_i32_0 = arith.constant 0 : i32
    %c0_i32_1 = arith.constant 0 : i32
    return %c0_i32, %c0_i32_0 : i32, i32
  }
  func.func @transform_9(%arg0: i32) -> (i32, i32) {
    %c0_i32 = arith.constant 0 : i32
    %c0_i32_0 = arith.constant 0 : i32
    %c0_i32_1 = arith.constant 0 : i32
    return %c0_i32, %c0_i32_0 : i32, i32
  }
  func.func @transform_10(%arg0: i32) -> (i32, i32) {
    %c0_i32 = arith.constant 0 : i32
    %c0_i32_0 = arith.constant 0 : i32
    %c0_i32_1 = arith.constant 0 : i32
    return %c0_i32, %c0_i32_0 : i32, i32
  }
  func.func @transform_11(%arg0: i32) -> (i32, i32) {
    %c0_i32 = arith.constant 0 : i32
    %c0_i32_0 = arith.constant 0 : i32
    return %c0_i32, %arg0 : i32, i32
  }
}

module attributes {stable_mosaic.version = 11 : i64} {
  func.func @scatter_mean_kernel(%arg0: i32, %arg1: i32, %arg2: memref<128x1xi32, #tpu.memory_space<vmem>>, %arg3: memref<9x128xbf16, #tpu.memory_space<vmem>>, %arg4: memref<8x128xf32, #tpu.memory_space<vmem>>, %arg5: memref<9x128xf32, #tpu.memory_space<vmem>>) attributes {dimension_semantics = [#tpu.dimension_semantics<parallel>, #tpu.dimension_semantics<arbitrary>], iteration_bounds = array<i64: 1, 1>, scalar_prefetch = 0 : i64, scratch_operands = 1 : i64, tpu.core_type = #tpu.core_type<tc>, window_params = [{transform_indices = @transform_0, window_bounds = array<i64: 128, 1>}, {transform_indices = @transform_1, window_bounds = array<i64: 9, 128>}, {transform_indices = @transform_2, window_bounds = array<i64: 8, 128>}]} {
    %c0_i32 = arith.constant 0 : i32
    %0 = arith.cmpi eq, %arg1, %c0_i32 : i32
    %1 = arith.extui %0 : i1 to i32
    %c0_i32_0 = arith.constant 0 : i32
    %2 = arith.cmpi ne, %1, %c0_i32_0 : i32
    scf.if %2 {
      %cst_10 = arith.constant 0.000000e+00 : f32
      %21 = vector.broadcast %cst_10 : f32 to vector<9x128xf32>
      %c0_11 = arith.constant 0 : index
      %c0_12 = arith.constant 0 : index
      %22 = vector.load %arg5[%c0_11, %c0_12] : memref<9x128xf32, #tpu.memory_space<vmem>>, vector<9x128xf32>
      tpu.vector_store %arg5[%c0_11, %c0_12], %21 {strides = array<i32>} : memref<9x128xf32, #tpu.memory_space<vmem>>, vector<9x128xf32>,
    } else {
    }
    %c0 = arith.constant 0 : index
    %c0_1 = arith.constant 0 : index
    %3 = vector.load %arg2[%c0, %c0_1] : memref<128x1xi32, #tpu.memory_space<vmem>>, vector<128x1xi32>
    %c128_i32 = arith.constant 128 : i32
    %4 = arith.muli %arg0, %c128_i32 : i32
    %5 = vector.broadcast %4 : i32 to vector<128x1xi32>
    %6 = arith.subi %3, %5 : vector<128x1xi32>
    %7 = tpu.iota {dimensions = array<i32: 1>} : vector<128x128xi32>
    %8 = vector.broadcast %6 : vector<128x1xi32> to vector<128x128xi32>
    %9 = arith.cmpi eq, %7, %8 : vector<128x128xi32>
    %10 = arith.extui %9 : vector<128x128xi1> to vector<128x128xi32>
    %11 = arith.sitofp %10 : vector<128x128xi32> to vector<128x128xf32>
    %12 = arith.truncf %11 : vector<128x128xf32> to vector<128x128xbf16>
    %c0_2 = arith.constant 0 : index
    %c0_3 = arith.constant 0 : index
    %13 = vector.load %arg5[%c0_2, %c0_3] : memref<9x128xf32, #tpu.memory_space<vmem>>, vector<9x128xf32>
    %c0_4 = arith.constant 0 : index
    %c0_5 = arith.constant 0 : index
    %14 = vector.load %arg3[%c0_4, %c0_5] : memref<9x128xbf16, #tpu.memory_space<vmem>>, vector<9x128xbf16>
    %cst = arith.constant dense<0.000000e+00> : vector<9x128xf32>
    %15 = tpu.matmul %14, %12, %cst {dimension_numbers = #tpu.dot_dimension_numbers<[1], [0], [0], [1], [0, 0, 1, 1], [], []>} : vector<9x128xbf16>, vector<128x128xbf16>, vector<9x128xf32> -> vector<9x128xf32>
    %16 = arith.addf %13, %15 : vector<9x128xf32>
    %c0_6 = arith.constant 0 : index
    %c0_7 = arith.constant 0 : index
    %17 = vector.load %arg5[%c0_6, %c0_7] : memref<9x128xf32, #tpu.memory_space<vmem>>, vector<9x128xf32>
    tpu.vector_store %arg5[%c0_6, %c0_7], %16 {strides = array<i32>} : memref<9x128xf32, #tpu.memory_space<vmem>>, vector<9x128xf32>,
    %c0_i32_8 = arith.constant 0 : i32
    %18 = arith.cmpi eq, %arg1, %c0_i32_8 : i32
    %19 = arith.extui %18 : i1 to i32
    %c0_i32_9 = arith.constant 0 : i32
    %20 = arith.cmpi ne, %19, %c0_i32_9 : i32
    scf.if %20 {
      %c0_10 = arith.constant 0 : index
      %c0_11 = arith.constant 0 : index
      %21 = vector.load %arg5[%c0_10, %c0_11] : memref<9x128xf32, #tpu.memory_space<vmem>>, vector<9x128xf32>
      %22 = vector.extract_strided_slice %21 {offsets = [8, 0], sizes = [1, 128], strides = [1, 1]} : vector<9x128xf32> to vector<1x128xf32>
      %cst_12 = arith.constant 1.000000e+00 : f32
      %23 = vector.broadcast %cst_12 : f32 to vector<1x128xf32>
      %24 = arith.maximumf %22, %23 : vector<1x128xf32>
      %25 = vector.extract_strided_slice %21 {offsets = [0, 0], sizes = [8, 128], strides = [1, 1]} : vector<9x128xf32> to vector<8x128xf32>
      %26 = tpu.reciprocal %24 {approx = true} : vector<1x128xf32> -> vector<1x128xf32>
      %27 = vector.broadcast %26 : vector<1x128xf32> to vector<8x128xf32>
      %28 = arith.mulf %25, %27 : vector<8x128xf32>
      %c0_13 = arith.constant 0 : index
      %c0_14 = arith.constant 0 : index
      %29 = vector.load %arg4[%c0_13, %c0_14] : memref<8x128xf32, #tpu.memory_space<vmem>>, vector<8x128xf32>
      tpu.vector_store %arg4[%c0_13, %c0_14], %28 {strides = array<i32>} : memref<8x128xf32, #tpu.memory_space<vmem>>, vector<8x128xf32>,
    } else {
    }
    return
  }
  func.func @transform_0(%arg0: i32, %arg1: i32) -> (i32, i32) {
    %c0_i32 = arith.constant 0 : i32
    %c0_i32_0 = arith.constant 0 : i32
    return %arg1, %c0_i32 : i32, i32
  }
  func.func @transform_1(%arg0: i32, %arg1: i32) -> (i32, i32) {
    %c0_i32 = arith.constant 0 : i32
    %c0_i32_0 = arith.constant 0 : i32
    return %c0_i32, %arg1 : i32, i32
  }
  func.func @transform_2(%arg0: i32, %arg1: i32) -> (i32, i32) {
    %c0_i32 = arith.constant 0 : i32
    %c0_i32_0 = arith.constant 0 : i32
    return %c0_i32, %arg0 : i32, i32
  }
}

</mosaic_0001>

<bundles_post_ra>
// kernel: clsf_forward.3
= control target key start
LH: loop header
LB: loop body
LE: loop exit
PB: predicated region body
PF: predicated region fallthrough
CT: control target
= control target key end

     0   :  { %v301_v0 = vmov 0   ;;  %v302_v7 = vmov 0.0   ;;  %vm303_vm0 = vmmov 0   ;;  %v52_v18 = vlaneseq  ;;  %s386_s0 = inlined_call_operand.vmem [shape: s32[128,1], index: 0, kind: input, shape index: {}]   ;;  %s387_s1 = inlined_call_operand.vmem [shape: bf16[9,128], index: 1, kind: input, shape index: {}]   ;;  %s388_s2 = inlined_call_operand.vmem [shape: f32[8,128], index: 2, kind: output, shape index: {}]  }
   0x1   :  { %297 = vset.pattern.permute.xlu1 %v301_v0  ;;  %296 = vset.pattern.permute.xlu0 %v301_v0  ;;  %v20_v1 = vld [vmem:[%s386_s0 + $0x10] sm:$0xff]  ;;  %v18_v2 = vld [vmem:[%s386_s0] sm:$0xff]  ;;  %v21_v3 = vld [vmem:[%s386_s0 + $0x18] sm:$0xff]  ;;  %17 = vst [vmem:[#allocation2 + $0x8] sm:$0x1] %v302_v7 }
   0x2   :  { %61 = vperm.xlu1 %297, %v20_v1   ;;  %55 = vperm.xlu0 %296, %v18_v2   ;;  %v19_v4 = vld [vmem:[%s386_s0 + $0x8] sm:$0xff]  ;;  %v22_v6 = vld [vmem:[%s386_s0 + $0x20] sm:$0xff]  ;;  %v25_v8 = vld [vmem:[%s386_s0 + $0x38] sm:$0xff]  ;;  %v53_v21 = vand.u32 127, %v52_v18  ;;  %v304_v24 = vmov 1.0|1.0  }
   0x3   :  { %v23_v5 = vld [vmem:[%s386_s0 + $0x28] sm:$0xff]  ;;  %272 = vmatprep.subr.bf16.mxu0 %v302_v7  ;;  %v24_v9 = vld [vmem:[%s386_s0 + $0x30] sm:$0xff]  ;;  %v26_v11 = vld [vmem:[%s386_s0 + $0x40] sm:$0xff]  ;;  %288 = vmatprep.mubr.msk.bf16.mxu0 %vm303_vm0, %v302_v7  ;;  %v221_v46 = vshrl.u32 %v52_v18, 7 }
   0x4   :  { %v27_v10 = vld [vmem:[%s386_s0 + $0x48] sm:$0xff]  ;;  %v29_v12 = vld [vmem:[%s386_s0 + $0x58] sm:$0xff]  ;;  %v28_v13 = vld [vmem:[%s386_s0 + $0x50] sm:$0xff] }
   0x5   :  { %v31_v14 = vld [vmem:[%s386_s0 + $0x68] sm:$0xff]  ;;  %v30_v15 = vld [vmem:[%s386_s0 + $0x60] sm:$0xff]  ;;  %v33_v16 = vld [vmem:[%s386_s0 + $0x78] sm:$0xff]  ;;  %v222_v47 = vsub.s32 0, %v221_v46 }
   0x6   :  { %64 = vperm.xlu1 %297, %v21_v3   ;;  %58 = vperm.xlu0 %296, %v19_v4   ;;  %v32_v17 = vld [vmem:[%s386_s0 + $0x70] sm:$0xff]  ;;  %v298_v37 = vld [vmem:[%s387_s1] sm:$0x1f]  }
   0x8   :  { %v159_v39 = vld [vmem:[#allocation2 + $0x8] sm:$0x1] }
   0xa   :  { %70 = vperm.xlu1 %297, %v23_v5   ;;  %67 = vperm.xlu0 %296, %v22_v6  }
   0xe   :  { %76 = vperm.xlu1 %297, %v25_v8   ;;  %73 = vperm.xlu0 %296, %v24_v9  }
  0x12   :  { %82 = vperm.xlu1 %297, %v27_v10   ;;  %79 = vperm.xlu0 %296, %v26_v11  }
  0x16   :  { %88 = vperm.xlu1 %297, %v29_v12   ;;  %85 = vperm.xlu0 %296, %v28_v13  }
  0x1a   :  { %94 = vperm.xlu1 %297, %v31_v14   ;;  %91 = vperm.xlu0 %296, %v30_v15  }
  0x1e   :  { %100 = vperm.xlu1 %297, %v33_v16   ;;  %97 = vperm.xlu0 %296, %v32_v17  }
  0x81   :  { %v62_v19 = vpop.permute.xlu1 %61  ;;  %v56_v20 = vpop.permute.xlu0 %55 }
  0x82   :  { %vm102_vm2 = vcmp.eq.s32.totalorder %v53_v21, %v56_v20  ;;  %vm104_vm4 = vcmp.eq.s32.totalorder %v53_v21, %v62_v19 }
  0x85   :  { %v65_v22 = vpop.permute.xlu1 %64  ;;  %v59_v23 = vpop.permute.xlu0 %58 }
  0x86   :  { %vm103_vm1 = vcmp.eq.s32.totalorder %v53_v21, %v59_v23  ;;  %vm105_vm5 = vcmp.eq.s32.totalorder %v53_v21, %v65_v22 }
  0x87   :  { %vm247_vm3 = vmpackc.low %vm103_vm1, %vm102_vm2 }
  0x88   :  { %273 = vmatpush3.bf16.msk.msra.mxu0 %vm247_vm3, %v304_v24  ;;  %vm249_vm6 = vmpackc.low %vm105_vm5, %vm104_vm4 }
  0x89   :  { %v71_v25 = vpop.permute.xlu1 %70  ;;  %v68_v26 = vpop.permute.xlu0 %67  ;;  %274 = vmatprep.subr.bf16.mxu0 %v302_v7 }
  0x8a   :  { %vm107_vm7 = vcmp.eq.s32.totalorder %v53_v21, %v71_v25  ;;  %vm106_vm8 = vcmp.eq.s32.totalorder %v53_v21, %v68_v26 }
  0x8b   :  { %vm251_vm9 = vmpackc.low %vm107_vm7, %vm106_vm8 }
  0x8c   :  { %275 = vmatpush3.bf16.msk.msra.mxu0 %vm249_vm6, %v304_v24 }
  0x8d   :  { %v77_v27 = vpop.permute.xlu1 %76  ;;  %v74_v28 = vpop.permute.xlu0 %73  ;;  %276 = vmatprep.subr.bf16.mxu0 %v302_v7 }
  0x8e   :  { %vm109_vm10 = vcmp.eq.s32.totalorder %v53_v21, %v77_v27  ;;  %vm108_vm11 = vcmp.eq.s32.totalorder %v53_v21, %v74_v28 }
  0x8f   :  { %vm253_vm12 = vmpackc.low %vm109_vm10, %vm108_vm11 }
  0x90   :  { %277 = vmatpush3.bf16.msk.msra.mxu0 %vm251_vm9, %v304_v24 }
  0x91   :  { %v83_v29 = vpop.permute.xlu1 %82  ;;  %v80_v30 = vpop.permute.xlu0 %79  ;;  %278 = vmatprep.subr.bf16.mxu0 %v302_v7 }
  0x92   :  { %vm111_vm13 = vcmp.eq.s32.totalorder %v53_v21, %v83_v29  ;;  %vm110_vm14 = vcmp.eq.s32.totalorder %v53_v21, %v80_v30 }
  0x93   :  { %vm255_vm15 = vmpackc.low %vm111_vm13, %vm110_vm14 }
  0x94   :  { %279 = vmatpush3.bf16.msk.msra.mxu0 %vm253_vm12, %v304_v24 }
  0x95   :  { %v89_v31 = vpop.permute.xlu1 %88  ;;  %v86_v32 = vpop.permute.xlu0 %85  ;;  %280 = vmatprep.subr.bf16.mxu0 %v302_v7 }
  0x96   :  { %vm113_vm0 = vcmp.eq.s32.totalorder %v53_v21, %v89_v31  ;;  %vm112_vm1 = vcmp.eq.s32.totalorder %v53_v21, %v86_v32 }
  0x97   :  { %vm257_vm2 = vmpackc.low %vm113_vm0, %vm112_vm1 }
  0x98   :  { %281 = vmatpush3.bf16.msk.msra.mxu0 %vm255_vm15, %v304_v24 }
  0x99   :  { %v95_v33 = vpop.permute.xlu1 %94  ;;  %v92_v34 = vpop.permute.xlu0 %91  ;;  %282 = vmatprep.subr.bf16.mxu0 %v302_v7 }
  0x9a   :  { %vm115_vm3 = vcmp.eq.s32.totalorder %v53_v21, %v95_v33  ;;  %vm114_vm4 = vcmp.eq.s32.totalorder %v53_v21, %v92_v34 }
  0x9b   :  { %vm259_vm5 = vmpackc.low %vm115_vm3, %vm114_vm4 }
  0x9c   :  { %283 = vmatpush3.bf16.msk.msra.mxu0 %vm257_vm2, %v304_v24 }
  0x9d   :  { %v101_v35 = vpop.permute.xlu1 %100  ;;  %v98_v36 = vpop.permute.xlu0 %97  ;;  %284 = vmatprep.subr.bf16.mxu0 %v302_v7 }
  0x9e   :  { %vm117_vm6 = vcmp.eq.s32.totalorder %v53_v21, %v101_v35  ;;  %vm116_vm7 = vcmp.eq.s32.totalorder %v53_v21, %v98_v36 }
  0x9f   :  { %vm261_vm8 = vmpackc.low %vm117_vm6, %vm116_vm7 }
  0xa0   :  { %285 = vmatpush3.bf16.msk.msra.mxu0 %vm259_vm5, %v304_v24 }
  0xa1   :  { %286 = vmatprep.subr.bf16.mxu0 %v302_v7 }
  0xa4   :  { %287 = vmatpush3.bf16.msk.msra.mxu0 %vm261_vm8, %v304_v24 }
  0xa7   :  { %289 = vmatmul.mubr.bf16.vlgmr.msra.gmra.mrb[0].mxu0 %v298_v37 }
 0x17a   :  { %v202_v38 = vpop.f32.mrb[0].mxu0 }
 0x17b   :  { %v290_v40 = vpop.f32.mrb[1].mxu0 }
 0x17c   :  { %v205_v41 = vpop.f32.mrb[2].mxu0 }
 0x17d   :  { %v210_v42 = vadd.f32 %v205_v41, %v159_v39  ;;  %v291_v43 = vpop.f32.mrb[3].mxu0 }
 0x17f   :  { %212 = vst [vmem:[#allocation2 + $0x8] sm:$0x1] %v210_v42 }
 0x186   :  { %v217_v44 = vld [vmem:[#allocation2 + $0x8] sm:$0x1] }
 0x187   :  { %v218_v45 = vmax.f32 %v217_v44, 1.0 }
 0x189   :  { %299 = vrcp.f32 %v218_v45 }
 0x193   :  { %v300_v48 = vpop.eup %299 }
 0x194   :  { %v223_v49 = vrot.slane %v300_v48, %v222_v47 }
 0x196   :  { %v224_v50 = vmul.f32 %v223_v49, %v202_v38 }
 0x198   :  { %225 = vst [vmem:[%s388_s2] sm:$0xff] %v224_v50 }

// kernel: clsf_forward.2
= control target key start
LH: loop header
LB: loop body
LE: loop exit
PB: predicated region body
PF: predicated region fallthrough
CT: control target
= control target key end

     0   :  { %vm134_vm0 = vcmask 1043456   ;;  %vm135_vm1 = vcmask 1044480   ;;  %vm109_vm2 = vcmask 72704   ;;  %v1918_v1 = vmov 65535   ;;  %s2450_s2 = inlined_call_operand.vmem [shape: bf16[9,32], index: 2, kind: input, shape index: {}]   ;;  %s2451_s0 = inlined_call_operand.vmem [shape: bf16[128,9], index: 0, kind: input, shape index: {}]   ;;  %s2452_s4 = inlined_call_operand.vmem [shape: bf16[32,32], index: 4, kind: input, shape index: {}]   ;;  %s2453_s3 = inlined_call_operand.vmem [shape: f32[1,32], index: 3, kind: input, shape index: {}]   ;;  %s2454_s6 = inlined_call_operand.vmem [shape: bf16[32,32], index: 6, kind: input, shape index: {}]   ;;  %s2455_s5 = inlined_call_operand.vmem [shape: f32[1,32], index: 5, kind: input, shape index: {}]   ;;  %s2456_s8 = inlined_call_operand.vmem [shape: bf16[32,32], index: 8, kind: input, shape index: {}]   ;;  %s2457_s7 = inlined_call_operand.vmem [shape: f32[1,32], index: 7, kind: input, shape index: {}]   ;;  %s2458_s9 = inlined_call_operand.vmem [shape: f32[1,32], index: 9, kind: input, shape index: {}]   ;;  %s2459_s10 = inlined_call_operand.vmem [shape: f32[1,32], index: 10, kind: input, shape index: {}]   ;;  %s2460_s1 = inlined_call_operand.vmem [shape: f32[9,128], index: 1, kind: input, shape index: {}]   ;;  %s2461_s11 = inlined_call_operand.vmem [shape: bf16[9,128], index: 11, kind: output, shape index: {}]  }
   0x1   :  { %v1647_v0 = vld [vmem:[%s2450_s2] sm:$0x1f]   ;;  %v136_v2 = vsel %vm134_vm0, 4294967295, %v1918_v1  ;;  %v1649_v7 = vld [vmem:[%s2451_s0 + $0x8] sm:$0xff]   ;;  %v1652_v9 = vld [vmem:[%s2451_s0 + $0x10] sm:$0xff]   ;;  %vm381_vm3 = vcmask 261120  }
   0x2   :  { %v1648_v3 = vld [vmem:[%s2451_s0] sm:$0xff]   ;;  %v137_v4 = vsel %vm135_vm1, %v136_v2, 0  ;;  %v1651_v8 = vld [vmem:[%s2451_s0 + $0x28] sm:$0xff]   ;;  %v1654_v10 = vld [vmem:[%s2451_s0 + $0x30] sm:$0xff]   ;;  %vm1920_vm4 = vmmov 0   ;;  %vm1293_vm7 = vcmask 1040384  }
   0x3   :  { %v139_v5 = vand.u32 %v1647_v0, %v137_v4  ;;  %1498 = vmatprep.mubr.msk.bf16.mxu0 %vm109_vm2, %v1648_v3  ;;  %v1650_v6 = vld [vmem:[%s2451_s0 + $0x20] sm:$0xff]   ;;  %v1653_v11 = vld [vmem:[%s2451_s0 + $0x18] sm:$0xff]   ;;  %v1657_v14 = vld [vmem:[%s2452_s4 + $0x8] sm:$0xff]   ;;  %vm1294_vm8 = vsmask.f32 256 }
   0x4   :  { %1506 = vmatprep.mubr.msk.bf16.mxu1 %vm109_vm2, %v1650_v6  ;;  %v1655_v12 = vld [vmem:[%s2451_s0 + $0x38] sm:$0xff]   ;;  %v1656_v13 = vld [vmem:[%s2452_s4] sm:$0xff]   ;;  %vm2391_vm5 = vmpackc.low %vm381_vm3, %vm381_vm3 }
   0x5   :  { %1496 = vmatprep.subr.bf16.mxu0 %v139_v5  ;;  %1641 = vmatprep.subr.bf16.mxu1 %v139_v5  ;;  %v2026_v15 = vld [vmem:[%s2453_s3] ss:$0 sm:$0xff]  ;;  %vm1295_vm9 = vmand %vm1293_vm7, %vm1294_vm8 }
   0x6   :  { %1497 = vmatpush3.bf16.msra.mxu0 %v139_v5  ;;  %1642 = vmatpush3.bf16.msra.mxu1 %v139_v5 }
   0x7   :  { %1514 = vmatprep.subr.bf16.mxu1 %v1656_v13 }
   0x9   :  { %1499 = vmatmul.mubr.msk.bf16.vlgmr.msra.gmra.mrb[0].mxu0 %vm109_vm2, %v1649_v7  ;;  %1507 = vmatmul.mubr.msk.bf16.vlgmr.msra.gmra.mrb[0].mxu1 %vm109_vm2, %v1651_v8 }
   0xa   :  { %1502 = vmatprep.mubr.msk.bf16.mxu0 %vm109_vm2, %v1652_v9  ;;  %1510 = vmatprep.mubr.msk.bf16.mxu1 %vm109_vm2, %v1654_v10 }
   0xb   :  { %1515 = vmatpush3.bf16.msra.mxu1 %v1656_v13 }
   0xc   :  { %1516 = vmatprep.subr.bf16.mxu1 %v1657_v14 }
   0xf   :  { %1517 = vmatpush3.bf16.msra.mxu1 %v1657_v14 }
  0x11   :  { %1503 = vmatmul.mubr.msk.bf16.gmra.mrb[4].mxu0 %vm109_vm2, %v1653_v11  ;;  %1511 = vmatmul.mubr.msk.bf16.gmra.mrb[4].mxu1 %vm109_vm2, %v1655_v12 }
  0xdc   :  { %v1500_v16 = vpop.f32.mrb[0].mxu0  ;;  %v1508_v17 = vpop.f32.mrb[0].mxu1 }
  0xdd   :  { %v2029_v18 = vadd.f32 %v1500_v16, %v2026_v15  ;;  %v175_v19 = vpop.f32.mrb[1].mxu0  ;;  %v2032_v20 = vadd.f32 %v1508_v17, %v2026_v15  ;;  %v207_v21 = vpop.f32.mrb[1].mxu1 }
  0xde   :  { %v2035_v22 = vadd.f32 %v2026_v15, %v175_v19  ;;  %v1501_v23 = vpop.f32.mrb[2].mxu0  ;;  %v2038_v24 = vadd.f32 %v2026_v15, %v207_v21  ;;  %v1509_v25 = vpop.f32.mrb[2].mxu1 }
  0xdf   :  { %v1323_v26 = vmul.f32 -1.442695, %v2029_v18  ;;  %v2042_v27 = vadd.f32 %v1501_v23, %v2026_v15  ;;  %v178_v28 = vpop.f32.mrb[3].mxu0  ;;  %v2045_v29 = vadd.f32 %v1509_v25, %v2026_v15  ;;  %v210_v30 = vpop.f32.mrb[3].mxu1  ;;  %v1331_v35 = vmul.f32 -1.442695, %v2032_v20 }
  0xe0   :  { %v1321_v31 = vmul.f32 -1.442695, %v2035_v22  ;;  %v2049_v32 = vadd.f32 %v2026_v15, %v178_v28  ;;  %v2052_v33 = vadd.f32 %v2026_v15, %v210_v30  ;;  %v1329_v37 = vmul.f32 -1.442695, %v2038_v24 }
  0xe1   :  { %1662 = vpow2.f32 %v1323_v26  ;;  %v1324_v34 = vmul.f32 -1.442695, %v2042_v27  ;;  %v1332_v38 = vmul.f32 -1.442695, %v2045_v29 }
  0xe2   :  { %1664 = vpow2.f32 %v1321_v31  ;;  %v1322_v36 = vmul.f32 -1.442695, %v2049_v32  ;;  %v1330_v39 = vmul.f32 -1.442695, %v2052_v33 }
  0xe3   :  { %1666 = vpow2.f32 %v1324_v34 }
  0xe4   :  { %1668 = vpow2.f32 %v1322_v36  ;;  %v1504_v40 = vpop.f32.mrb[4].mxu0  ;;  %v1512_v41 = vpop.f32.mrb[4].mxu1 }
  0xe5   :  { %1670 = vpow2.f32 %v1331_v35  ;;  %v2061_v42 = vadd.f32 %v1504_v40, %v2026_v15  ;;  %v191_v43 = vpop.f32.mrb[5].mxu0  ;;  %v2064_v44 = vadd.f32 %v1512_v41, %v2026_v15  ;;  %v223_v45 = vpop.f32.mrb[5].mxu1 }
  0xe6   :  { %1672 = vpow2.f32 %v1329_v37  ;;  %v2067_v46 = vadd.f32 %v2026_v15, %v191_v43  ;;  %v1505_v47 = vpop.f32.mrb[6].mxu0  ;;  %v1513_v48 = vpop.f32.mrb[6].mxu1  ;;  %v2081_v11 = vadd.f32 %v2026_v15, %v223_v45 }
  0xe7   :  { %1674 = vpow2.f32 %v1332_v38  ;;  %v1327_v49 = vmul.f32 -1.442695, %v2061_v42  ;;  %v2071_v50 = vadd.f32 %v1505_v47, %v2026_v15  ;;  %v194_v51 = vpop.f32.mrb[7].mxu0  ;;  %v226_v52 = vpop.f32.mrb[7].mxu1  ;;  %v1335_v56 = vmul.f32 -1.442695, %v2064_v44 }
  0xe8   :  { %1676 = vpow2.f32 %v1330_v39  ;;  %v1325_v53 = vmul.f32 -1.442695, %v2067_v46  ;;  %v2075_v54 = vadd.f32 %v2026_v15, %v194_v51  ;;  %v2084_v14 = vadd.f32 %v1513_v48, %v2026_v15 }
  0xe9   :  { %1678 = vpow2.f32 %v1327_v49  ;;  %v1328_v55 = vmul.f32 -1.442695, %v2071_v50  ;;  %v2087_v19 = vadd.f32 %v2026_v15, %v226_v52  ;;  %v1333_v28 = vmul.f32 -1.442695, %v2081_v11 }
  0xea   :  { %1680 = vpow2.f32 %v1325_v53  ;;  %v1326_v57 = vmul.f32 -1.442695, %v2075_v54  ;;  %v1336_v31 = vmul.f32 -1.442695, %v2084_v14 }
  0xeb   :  { %v1663_v58 = vpop.eup %1662  ;;  %1682 = vpow2.f32 %v1328_v55  ;;  %v1334_v35 = vmul.f32 -1.442695, %v2087_v19 }
  0xec   :  { %v1665_v59 = vpop.eup %1664  ;;  %v288_v60 = vadd.f32 1.0, %v1663_v58  ;;  %1684 = vpow2.f32 %v1326_v57 }
  0xed   :  { %v1667_v61 = vpop.eup %1666  ;;  %v286_v62 = vadd.f32 1.0, %v1665_v59  ;;  %1686 = vpow2.f32 %v1335_v56 }
  0xee   :  { %v1669_v63 = vpop.eup %1668  ;;  %1688 = vrcp.f32 %v288_v60  ;;  %v289_v0 = vadd.f32 1.0, %v1667_v61 }
  0xef   :  { %v1671_v1 = vpop.eup %1670  ;;  %1690 = vrcp.f32 %v286_v62  ;;  %v287_v2 = vadd.f32 1.0, %v1669_v63 }
  0xf0   :  { %v1673_v3 = vpop.eup %1672  ;;  %1692 = vrcp.f32 %v289_v0  ;;  %v296_v4 = vadd.f32 1.0, %v1671_v1 }
  0xf1   :  { %v1675_v5 = vpop.eup %1674  ;;  %1694 = vrcp.f32 %v287_v2  ;;  %v294_v6 = vadd.f32 1.0, %v1673_v3 }
  0xf2   :  { %v1677_v7 = vpop.eup %1676  ;;  %1696 = vrcp.f32 %v296_v4  ;;  %v297_v8 = vadd.f32 1.0, %v1675_v5 }
  0xf3   :  { %v1679_v9 = vpop.eup %1678  ;;  %1698 = vrcp.f32 %v294_v6  ;;  %v295_v10 = vadd.f32 1.0, %v1677_v7 }
  0xf4   :  { %v1681_v12 = vpop.eup %1680  ;;  %1700 = vrcp.f32 %v297_v8  ;;  %v292_v13 = vadd.f32 1.0, %v1679_v9  ;;  %v1658_v9 = vld [vmem:[%s2454_s6] sm:$0xff]  }
  0xf5   :  { %v1683_v16 = vpop.eup %1682  ;;  %1702 = vrcp.f32 %v295_v10  ;;  %v290_v17 = vadd.f32 1.0, %v1681_v12  ;;  %1534 = vmatprep.subr.bf16.mxu0 %v1658_v9  ;;  %v2125_v10 = vld [vmem:[%s2455_s5] ss:$0 sm:$0xff] }
  0xf6   :  { %v1685_v21 = vpop.eup %1684  ;;  %1704 = vrcp.f32 %v292_v13  ;;  %v293_v23 = vadd.f32 1.0, %v1683_v16  ;;  %1535 = vmatpush3.bf16.msra.mxu0 %v1658_v9 }
  0xf7   :  { %v1687_v25 = vpop.eup %1686  ;;  %1706 = vrcp.f32 %v290_v17  ;;  %v291_v26 = vadd.f32 1.0, %v1685_v21 }
  0xf8   :  { %v1689_v30 = vpop.eup %1688  ;;  %1708 = vrcp.f32 %v293_v23  ;;  %v300_v55 = vadd.f32 1.0, %v1687_v25 }
  0xf9   :  { %v1691_v34 = vpop.eup %1690  ;;  %1710 = vrcp.f32 %v291_v26  ;;  %v336_v15 = vmul.f32 %v1689_v30, %v2029_v18 }
  0xfa   :  { %v1693_v36 = vpop.eup %1692  ;;  %1712 = vpow2.f32 %v1333_v28  ;;  %v334_v40 = vmul.f32 %v1691_v34, %v2035_v22 }
  0xfb   :  { %v1695_v37 = vpop.eup %1694  ;;  %v337_v38 = vmul.f32 %v1693_v36, %v2042_v27  ;;  %1714 = vpow2.f32 %v1336_v31 }
  0xfc   :  { %v1697_v39 = vpop.eup %1696  ;;  %v335_v41 = vmul.f32 %v1695_v37, %v2049_v32  ;;  %1716 = vpow2.f32 %v1334_v35 }
  0xfd   :  { %v1699_v43 = vpop.eup %1698  ;;  %v351_v45 = vpack.c.bf16 %v337_v38, %v336_v15  ;;  %v344_v47 = vmul.f32 %v1697_v39, %v2032_v20  ;;  %1718 = vrcp.f32 %v300_v55 }
  0xfe   :  { %v1701_v48 = vpop.eup %1700  ;;  %v350_v49 = vpack.c.bf16 %v335_v41, %v334_v40  ;;  %v342_v51 = vmul.f32 %v1699_v43, %v2038_v24 }
  0xff   :  { %v1703_v18 = vpop.eup %1702  ;;  %v345_v27 = vmul.f32 %v1701_v48, %v2045_v29 }
 0x100   :  { %v1705_v52 = vpop.eup %1704  ;;  %v343_v53 = vmul.f32 %v1703_v18, %v2052_v33  ;;  %1518 = vmatprep.mubr.msk.bf16.mxu1 %vm381_vm3, %v350_v49 }
 0x101   :  { %v1707_v22 = vpop.eup %1706  ;;  %v355_v32 = vpack.c.bf16 %v345_v27, %v344_v47  ;;  %1519 = vmatmul.mubr.msk.bf16.vlgmr.msra.gmra.mrb[8].mxu1 %vm381_vm3, %v351_v45  ;;  %v340_v58 = vmul.f32 %v1705_v52, %v2061_v42 }
 0x102   :  { %v1709_v20 = vpop.eup %1708  ;;  %v354_v56 = vpack.c.bf16 %v343_v53, %v342_v51  ;;  %v338_v59 = vmul.f32 %v1707_v22, %v2067_v46 }
 0x103   :  { %v1711_v57 = vpop.eup %1710  ;;  %v341_v24 = vmul.f32 %v1709_v20, %v2071_v50 }
 0x104   :  { %v339_v29 = vmul.f32 %v1711_v57, %v2075_v54  ;;  %v1713_v60 = vpop.eup %1712 }
 0x105   :  { %v353_v33 = vpack.c.bf16 %v341_v24, %v340_v58  ;;  %v1715_v61 = vpop.eup %1714  ;;  %v298_v63 = vadd.f32 1.0, %v1713_v60 }
 0x106   :  { %v352_v62 = vpack.c.bf16 %v339_v29, %v338_v59  ;;  %v1717_v0 = vpop.eup %1716  ;;  %v301_v1 = vadd.f32 1.0, %v1715_v61 }
 0x107   :  { %1720 = vrcp.f32 %v298_v63  ;;  %v299_v2 = vadd.f32 1.0, %v1717_v0  ;;  %v1719_v42 = vpop.eup %1718 }
 0x108   :  { %1522 = vmatprep.mubr.msk.bf16.mxu1 %vm381_vm3, %v352_v62  ;;  %1722 = vrcp.f32 %v301_v1  ;;  %v348_v50 = vmul.f32 %v1719_v42, %v2064_v44  ;;  %v1659_v44 = vld [vmem:[%s2454_s6 + $0x8] sm:$0xff]  }
 0x109   :  { %1523 = vmatmul.mubr.msk.bf16.gmra.mrb[12].mxu1 %vm381_vm3, %v353_v33  ;;  %1724 = vrcp.f32 %v299_v2  ;;  %1536 = vmatprep.subr.bf16.mxu0 %v1659_v44 }
 0x10a   :  { %1526 = vmatprep.mubr.msk.bf16.mxu1 %vm381_vm3, %v354_v56  ;;  %1537 = vmatpush3.bf16.msra.mxu0 %v1659_v44 }
 0x111   :  { %1527 = vmatmul.mubr.msk.bf16.gmra.mrb[16].mxu1 %vm381_vm3, %v355_v32  ;;  %v1721_v46 = vpop.eup %1720 }
 0x112   :  { %v1723_v54 = vpop.eup %1722  ;;  %v346_v3 = vmul.f32 %v1721_v46, %v2081_v11 }
 0x113   :  { %v1725_v4 = vpop.eup %1724  ;;  %v349_v5 = vmul.f32 %v1723_v54, %v2084_v14 }
 0x114   :  { %v347_v6 = vmul.f32 %v1725_v4, %v2087_v19 }
 0x115   :  { %v357_v7 = vpack.c.bf16 %v349_v5, %v348_v50 }
 0x116   :  { %v356_v8 = vpack.c.bf16 %v347_v6, %v346_v3 }
 0x118   :  { %1530 = vmatprep.mubr.msk.bf16.mxu1 %vm381_vm3, %v356_v8 }
 0x119   :  { %1531 = vmatmul.mubr.msk.bf16.gmra.mrb[20].mxu1 %vm381_vm3, %v357_v7 }
 0x1d4   :  { %v1520_v11 = vpop.f32.mrb[8].mxu1 }
 0x1d5   :  { %v2128_v12 = vadd.f32 %v1520_v11, %v2125_v10  ;;  %v440_v13 = vpop.f32.mrb[9].mxu1 }
 0x1d6   :  { %v2131_v14 = vadd.f32 %v2125_v10, %v440_v13  ;;  %v1521_v16 = vpop.f32.mrb[10].mxu1 }
 0x1d7   :  { %v1350_v17 = vmul.f32 -1.442695, %v2128_v12  ;;  %v2135_v19 = vadd.f32 %v1521_v16, %v2125_v10  ;;  %v443_v21 = vpop.f32.mrb[11].mxu1 }
 0x1d8   :  { %v1348_v23 = vmul.f32 -1.442695, %v2131_v14  ;;  %v2139_v25 = vadd.f32 %v2125_v10, %v443_v21 }
 0x1d9   :  { %1726 = vpow2.f32 %v1350_v17  ;;  %v1351_v26 = vmul.f32 -1.442695, %v2135_v19 }
 0x1da   :  { %1728 = vpow2.f32 %v1348_v23  ;;  %v1349_v28 = vmul.f32 -1.442695, %v2139_v25 }
 0x1db   :  { %1730 = vpow2.f32 %v1351_v26 }
 0x1dc   :  { %1732 = vpow2.f32 %v1349_v28  ;;  %v1524_v30 = vpop.f32.mrb[12].mxu1 }
 0x1dd   :  { %v2144_v31 = vadd.f32 %v1524_v30, %v2125_v10  ;;  %v456_v34 = vpop.f32.mrb[13].mxu1 }
 0x1de   :  { %v2147_v35 = vadd.f32 %v2125_v10, %v456_v34  ;;  %v1525_v36 = vpop.f32.mrb[14].mxu1 }
 0x1df   :  { %v1354_v37 = vmul.f32 -1.442695, %v2144_v31  ;;  %v2151_v15 = vadd.f32 %v1525_v36, %v2125_v10  ;;  %v459_v38 = vpop.f32.mrb[15].mxu1 }
 0x1e0   :  { %v1352_v39 = vmul.f32 -1.442695, %v2147_v35  ;;  %v2155_v40 = vadd.f32 %v2125_v10, %v459_v38 }
 0x1e1   :  { %1734 = vpow2.f32 %v1354_v37  ;;  %v1355_v41 = vmul.f32 -1.442695, %v2151_v15 }
 0x1e2   :  { %1736 = vpow2.f32 %v1352_v39  ;;  %v1353_v43 = vmul.f32 -1.442695, %v2155_v40 }
 0x1e3   :  { %v1727_v45 = vpop.eup %1726  ;;  %1738 = vpow2.f32 %v1355_v41 }
 0x1e4   :  { %v1729_v47 = vpop.eup %1728  ;;  %v553_v48 = vadd.f32 1.0, %v1727_v45  ;;  %1740 = vpow2.f32 %v1353_v43  ;;  %v1528_v49 = vpop.f32.mrb[16].mxu1 }
 0x1e5   :  { %v1731_v51 = vpop.eup %1730  ;;  %v551_v18 = vadd.f32 1.0, %v1729_v47  ;;  %v2160_v27 = vadd.f32 %v1528_v49, %v2125_v10  ;;  %v472_v52 = vpop.f32.mrb[17].mxu1 }
 0x1e6   :  { %v1733_v53 = vpop.eup %1732  ;;  %1742 = vrcp.f32 %v553_v48  ;;  %v554_v22 = vadd.f32 1.0, %v1731_v51  ;;  %v2163_v32 = vadd.f32 %v2125_v10, %v472_v52  ;;  %v1529_v55 = vpop.f32.mrb[18].mxu1 }
 0x1e7   :  { %1744 = vrcp.f32 %v551_v18  ;;  %v552_v20 = vadd.f32 1.0, %v1733_v53  ;;  %v1358_v56 = vmul.f32 -1.442695, %v2160_v27  ;;  %v2167_v57 = vadd.f32 %v1529_v55, %v2125_v10  ;;  %v475_v58 = vpop.f32.mrb[19].mxu1 }
 0x1e8   :  { %1746 = vrcp.f32 %v554_v22  ;;  %v1356_v24 = vmul.f32 -1.442695, %v2163_v32  ;;  %v2171_v59 = vadd.f32 %v2125_v10, %v475_v58 }
 0x1e9   :  { %1748 = vrcp.f32 %v552_v20  ;;  %v1359_v29 = vmul.f32 -1.442695, %v2167_v57 }
 0x1ea   :  { %1750 = vpow2.f32 %v1358_v56  ;;  %v1357_v60 = vmul.f32 -1.442695, %v2171_v59 }
 0x1eb   :  { %v1735_v33 = vpop.eup %1734  ;;  %1752 = vpow2.f32 %v1356_v24 }
 0x1ec   :  { %v1737_v61 = vpop.eup %1736  ;;  %v557_v62 = vadd.f32 1.0, %v1735_v33  ;;  %1754 = vpow2.f32 %v1359_v29  ;;  %v1532_v1 = vpop.f32.mrb[20].mxu1 }
 0x1ed   :  { %v1739_v63 = vpop.eup %1738  ;;  %v555_v0 = vadd.f32 1.0, %v1737_v61  ;;  %1756 = vpow2.f32 %v1357_v60  ;;  %v2176_v46 = vadd.f32 %v1532_v1, %v2125_v10  ;;  %v488_v50 = vpop.f32.mrb[21].mxu1 }
 0x1ee   :  { %v1741_v2 = vpop.eup %1740  ;;  %1758 = vrcp.f32 %v557_v62  ;;  %v558_v42 = vadd.f32 1.0, %v1739_v63  ;;  %v2179_v3 = vadd.f32 %v2125_v10, %v488_v50  ;;  %v1533_v4 = vpop.f32.mrb[22].mxu1 }
 0x1ef   :  { %1760 = vrcp.f32 %v555_v0  ;;  %v556_v54 = vadd.f32 1.0, %v1741_v2  ;;  %v1362_v6 = vmul.f32 -1.442695, %v2176_v46  ;;  %v2183_v7 = vadd.f32 %v1533_v4, %v2125_v10  ;;  %v491_v8 = vpop.f32.mrb[23].mxu1 }
 0x1f0   :  { %v1743_v5 = vpop.eup %1742  ;;  %1762 = vrcp.f32 %v558_v42  ;;  %v1360_v44 = vmul.f32 -1.442695, %v2179_v3  ;;  %v2187_v11 = vadd.f32 %v2125_v10, %v491_v8 }
 0x1f1   :  { %v1745_v9 = vpop.eup %1744  ;;  %1764 = vrcp.f32 %v556_v54  ;;  %v1363_v16 = vmul.f32 -1.442695, %v2183_v7  ;;  %v601_v21 = vmul.f32 %v1743_v5, %v2128_v12 }
 0x1f2   :  { %v1747_v13 = vpop.eup %1746  ;;  %1766 = vpow2.f32 %v1362_v6  ;;  %v1361_v26 = vmul.f32 -1.442695, %v2187_v11  ;;  %v599_v30 = vmul.f32 %v1745_v9, %v2131_v14  ;;  %v1660_v6 = vld [vmem:[%s2456_s8] sm:$0xff]  }
 0x1f3   :  { %v1749_v17 = vpop.eup %1748  ;;  %v602_v23 = vmul.f32 %v1747_v13, %v2135_v19  ;;  %1768 = vpow2.f32 %v1360_v44  ;;  %1554 = vmatprep.subr.bf16.mxu1 %v1660_v6 }
 0x1f4   :  { %v1751_v28 = vpop.eup %1750  ;;  %v600_v34 = vmul.f32 %v1749_v17, %v2139_v25  ;;  %1770 = vpow2.f32 %v1363_v16  ;;  %1555 = vmatpush3.bf16.msra.mxu1 %v1660_v6 }
 0x1f5   :  { %v1753_v10 = vpop.eup %1752  ;;  %v616_v36 = vpack.c.bf16 %v602_v23, %v601_v21  ;;  %v561_v37 = vadd.f32 1.0, %v1751_v28  ;;  %1772 = vpow2.f32 %v1361_v26 }
 0x1f6   :  { %v1755_v38 = vpop.eup %1754  ;;  %v615_v39 = vpack.c.bf16 %v600_v34, %v599_v30  ;;  %v559_v41 = vadd.f32 1.0, %v1753_v10 }
 0x1f7   :  { %v1757_v43 = vpop.eup %1756  ;;  %1774 = vrcp.f32 %v561_v37  ;;  %v562_v12 = vadd.f32 1.0, %v1755_v38 }
 0x1f8   :  { %v1759_v19 = vpop.eup %1758  ;;  %1776 = vrcp.f32 %v559_v41  ;;  %v560_v45 = vadd.f32 1.0, %v1757_v43  ;;  %1538 = vmatprep.mubr.msk.bf16.mxu0 %vm381_vm3, %v615_v39 }
 0x1f9   :  { %v1761_v47 = vpop.eup %1760  ;;  %1778 = vrcp.f32 %v562_v12  ;;  %1539 = vmatmul.mubr.msk.bf16.vlgmr.msra.gmra.mrb[8].mxu0 %vm381_vm3, %v616_v36  ;;  %v605_v48 = vmul.f32 %v1759_v19, %v2144_v31 }
 0x1fa   :  { %v1763_v14 = vpop.eup %1762  ;;  %1780 = vrcp.f32 %v560_v45  ;;  %v603_v18 = vmul.f32 %v1761_v47, %v2147_v35 }
 0x1fb   :  { %v1765_v25 = vpop.eup %1764  ;;  %v606_v49 = vmul.f32 %v1763_v14, %v2151_v15 }
 0x1fc   :  { %v1767_v51 = vpop.eup %1766  ;;  %v604_v52 = vmul.f32 %v1765_v25, %v2155_v40 }
 0x1fd   :  { %v1769_v53 = vpop.eup %1768  ;;  %v618_v22 = vpack.c.bf16 %v606_v49, %v605_v48  ;;  %v565_v55 = vadd.f32 1.0, %v1767_v51 }
 0x1fe   :  { %v1771_v20 = vpop.eup %1770  ;;  %v617_v56 = vpack.c.bf16 %v604_v52, %v603_v18  ;;  %v563_v58 = vadd.f32 1.0, %v1769_v53 }
 0x1ff   :  { %v1773_v24 = vpop.eup %1772  ;;  %1782 = vrcp.f32 %v565_v55  ;;  %v566_v29 = vadd.f32 1.0, %v1771_v20 }
 0x200   :  { %1784 = vrcp.f32 %v563_v58  ;;  %v564_v60 = vadd.f32 1.0, %v1773_v24  ;;  %1542 = vmatprep.mubr.msk.bf16.mxu0 %vm381_vm3, %v617_v56 }
 0x201   :  { %v1775_v31 = vpop.eup %1774  ;;  %1786 = vrcp.f32 %v566_v29  ;;  %1543 = vmatmul.mubr.msk.bf16.gmra.mrb[12].mxu0 %vm381_vm3, %v618_v22 }
 0x202   :  { %v1777_v35 = vpop.eup %1776  ;;  %1788 = vrcp.f32 %v564_v60  ;;  %v609_v33 = vmul.f32 %v1775_v31, %v2160_v27 }
 0x203   :  { %v1779_v15 = vpop.eup %1778  ;;  %v607_v62 = vmul.f32 %v1777_v35, %v2163_v32 }
 0x204   :  { %v1781_v40 = vpop.eup %1780  ;;  %v610_v61 = vmul.f32 %v1779_v15, %v2167_v57 }
 0x205   :  { %v608_v63 = vmul.f32 %v1781_v40, %v2171_v59 }
 0x206   :  { %v620_v0 = vpack.c.bf16 %v610_v61, %v609_v33 }
 0x207   :  { %v619_v1 = vpack.c.bf16 %v608_v63, %v607_v62 }
 0x209   :  { %v1783_v2 = vpop.eup %1782  ;;  %1546 = vmatprep.mubr.msk.bf16.mxu0 %vm381_vm3, %v619_v1 }
 0x20a   :  { %v1785_v42 = vpop.eup %1784  ;;  %1547 = vmatmul.mubr.msk.bf16.gmra.mrb[16].mxu0 %vm381_vm3, %v620_v0  ;;  %v613_v4 = vmul.f32 %v1783_v2, %v2176_v46  ;;  %v1661_v46 = vld [vmem:[%s2456_s8 + $0x8] sm:$0xff]  }
 0x20b   :  { %v1787_v50 = vpop.eup %1786  ;;  %v611_v57 = vmul.f32 %v1785_v42, %v2179_v3  ;;  %1556 = vmatprep.subr.bf16.mxu1 %v1661_v46  ;;  %v2224_v3 = vld [vmem:[%s2457_s7] ss:$0 sm:$0xff] }
 0x20c   :  { %v1789_v54 = vpop.eup %1788  ;;  %v614_v27 = vmul.f32 %v1787_v50, %v2183_v7  ;;  %1557 = vmatpush3.bf16.msra.mxu1 %v1661_v46 }
 0x20d   :  { %v612_v32 = vmul.f32 %v1789_v54, %v2187_v11 }
 0x20e   :  { %v622_v5 = vpack.c.bf16 %v614_v27, %v613_v4 }
 0x20f   :  { %v621_v59 = vpack.c.bf16 %v612_v32, %v611_v57 }
 0x211   :  { %1550 = vmatprep.mubr.msk.bf16.mxu0 %vm381_vm3, %v621_v59 }
 0x212   :  { %1551 = vmatmul.mubr.msk.bf16.gmra.mrb[20].mxu0 %vm381_vm3, %v622_v5 }
 0x2cc   :  { %v1540_v7 = vpop.f32.mrb[8].mxu0 }
 0x2cd   :  { %v2227_v8 = vadd.f32 %v1540_v7, %v2224_v3  ;;  %v704_v9 = vpop.f32.mrb[9].mxu0 }
 0x2ce   :  { %v2230_v44 = vadd.f32 %v2224_v3, %v704_v9  ;;  %v1541_v11 = vpop.f32.mrb[10].mxu0 }
 0x2cf   :  { %v1377_v13 = vmul.f32 -1.442695, %v2227_v8  ;;  %v2234_v16 = vadd.f32 %v1541_v11, %v2224_v3  ;;  %v707_v17 = vpop.f32.mrb[11].mxu0 }
 0x2d0   :  { %v1375_v21 = vmul.f32 -1.442695, %v2230_v44  ;;  %v2238_v23 = vadd.f32 %v2224_v3, %v707_v17 }
 0x2d1   :  { %1790 = vpow2.f32 %v1377_v13  ;;  %v1378_v26 = vmul.f32 -1.442695, %v2234_v16 }
 0x2d2   :  { %1792 = vpow2.f32 %v1375_v21  ;;  %v1376_v28 = vmul.f32 -1.442695, %v2238_v23 }
 0x2d3   :  { %1794 = vpow2.f32 %v1378_v26 }
 0x2d4   :  { %1796 = vpow2.f32 %v1376_v28  ;;  %v1544_v30 = vpop.f32.mrb[12].mxu0 }
 0x2d5   :  { %v2243_v34 = vadd.f32 %v1544_v30, %v2224_v3  ;;  %v720_v10 = vpop.f32.mrb[13].mxu0 }
 0x2d6   :  { %v2246_v36 = vadd.f32 %v2224_v3, %v720_v10  ;;  %v1545_v37 = vpop.f32.mrb[14].mxu0 }
 0x2d7   :  { %v1381_v38 = vmul.f32 -1.442695, %v2243_v34  ;;  %v2250_v39 = vadd.f32 %v1545_v37, %v2224_v3  ;;  %v723_v41 = vpop.f32.mrb[15].mxu0 }
 0x2d8   :  { %v1379_v43 = vmul.f32 -1.442695, %v2246_v36  ;;  %v2254_v12 = vadd.f32 %v2224_v3, %v723_v41 }
 0x2d9   :  { %1798 = vpow2.f32 %v1381_v38  ;;  %v1382_v19 = vmul.f32 -1.442695, %v2250_v39 }
 0x2da   :  { %1800 = vpow2.f32 %v1379_v43  ;;  %v1380_v45 = vmul.f32 -1.442695, %v2254_v12 }
 0x2db   :  { %v1791_v47 = vpop.eup %1790  ;;  %1802 = vpow2.f32 %v1382_v19 }
 0x2dc   :  { %v1793_v14 = vpop.eup %1792  ;;  %v817_v25 = vadd.f32 1.0, %v1791_v47  ;;  %1804 = vpow2.f32 %v1380_v45 }
 0x2dd   :  { %v1795_v48 = vpop.eup %1794  ;;  %v815_v49 = vadd.f32 1.0, %v1793_v14  ;;  %v1548_v51 = vpop.f32.mrb[16].mxu0 }
 0x2de   :  { %v1797_v18 = vpop.eup %1796  ;;  %1806 = vrcp.f32 %v817_v25  ;;  %v818_v52 = vadd.f32 1.0, %v1795_v48  ;;  %v2259_v53 = vadd.f32 %v1548_v51, %v2224_v3  ;;  %v736_v22 = vpop.f32.mrb[17].mxu0 }
 0x2df   :  { %1808 = vrcp.f32 %v815_v49  ;;  %v816_v55 = vadd.f32 1.0, %v1797_v18  ;;  %v2262_v20 = vadd.f32 %v2224_v3, %v736_v22  ;;  %v1549_v56 = vpop.f32.mrb[18].mxu0 }
 0x2e0   :  { %1810 = vrcp.f32 %v818_v52  ;;  %v1385_v58 = vmul.f32 -1.442695, %v2259_v53  ;;  %v2266_v24 = vadd.f32 %v1549_v56, %v2224_v3  ;;  %v739_v29 = vpop.f32.mrb[19].mxu0 }
 0x2e1   :  { %1812 = vrcp.f32 %v816_v55  ;;  %v1383_v60 = vmul.f32 -1.442695, %v2262_v20  ;;  %v2270_v31 = vadd.f32 %v2224_v3, %v739_v29 }
 0x2e2   :  { %1814 = vpow2.f32 %v1385_v58  ;;  %v1386_v35 = vmul.f32 -1.442695, %v2266_v24 }
 0x2e3   :  { %v1799_v15 = vpop.eup %1798  ;;  %1816 = vpow2.f32 %v1383_v60  ;;  %v1384_v40 = vmul.f32 -1.442695, %v2270_v31 }
 0x2e4   :  { %v1801_v33 = vpop.eup %1800  ;;  %v821_v61 = vadd.f32 1.0, %v1799_v15  ;;  %1818 = vpow2.f32 %v1386_v35 }
 0x2e5   :  { %v1803_v62 = vpop.eup %1802  ;;  %v819_v63 = vadd.f32 1.0, %v1801_v33  ;;  %1820 = vpow2.f32 %v1384_v40  ;;  %v1552_v0 = vpop.f32.mrb[20].mxu0 }
 0x2e6   :  { %v1805_v1 = vpop.eup %1804  ;;  %1822 = vrcp.f32 %v821_v61  ;;  %v822_v2 = vadd.f32 1.0, %v1803_v62  ;;  %v2275_v42 = vadd.f32 %v1552_v0, %v2224_v3  ;;  %v752_v50 = vpop.f32.mrb[21].mxu0 }
 0x2e7   :  { %1824 = vrcp.f32 %v819_v63  ;;  %v820_v54 = vadd.f32 1.0, %v1805_v1  ;;  %v2278_v4 = vadd.f32 %v2224_v3, %v752_v50  ;;  %v1553_v27 = vpop.f32.mrb[22].mxu0 }
 0x2e8   :  { %v1807_v57 = vpop.eup %1806  ;;  %1826 = vrcp.f32 %v822_v2  ;;  %v1389_v32 = vmul.f32 -1.442695, %v2275_v42  ;;  %v2282_v5 = vadd.f32 %v1553_v27, %v2224_v3  ;;  %v755_v59 = vpop.f32.mrb[23].mxu0 }
 0x2e9   :  { %v1809_v6 = vpop.eup %1808  ;;  %1828 = vrcp.f32 %v820_v54  ;;  %v1387_v46 = vmul.f32 -1.442695, %v2278_v4  ;;  %v2286_v7 = vadd.f32 %v2224_v3, %v755_v59  ;;  %v865_v17 = vmul.f32 %v1807_v57, %v2227_v8 }
 0x2ea   :  { %v1811_v9 = vpop.eup %1810  ;;  %1830 = vpow2.f32 %v1389_v32  ;;  %v1390_v11 = vmul.f32 -1.442695, %v2282_v5  ;;  %v863_v30 = vmul.f32 %v1809_v6, %v2230_v44  ;;  %v1919_v32 = vmov 0.0|0.0  }
 0x2eb   :  { %v1813_v13 = vpop.eup %1812  ;;  %v866_v21 = vmul.f32 %v1811_v9, %v2234_v16  ;;  %1832 = vpow2.f32 %v1387_v46  ;;  %v1388_v26 = vmul.f32 -1.442695, %v2286_v7  ;;  %1609 = vmatprep.subr.bf16.mxu0 %v1919_v32  ;;  %v1921_v59 = vmov 0.0  }
 0x2ec   :  { %v1815_v28 = vpop.eup %1814  ;;  %v864_v10 = vmul.f32 %v1813_v13, %v2238_v23  ;;  %1834 = vpow2.f32 %v1390_v11  ;;  %1606 = vmatprep.mubr.msk.f32.mxu0 %vm1920_vm4, %v1921_v59 }
 0x2ed   :  { %v1817_v3 = vpop.eup %1816  ;;  %v880_v37 = vpack.c.bf16 %v866_v21, %v865_v17  ;;  %v825_v38 = vadd.f32 1.0, %v1815_v28  ;;  %1836 = vpow2.f32 %v1388_v26 }
 0x2ee   :  { %v1819_v41 = vpop.eup %1818  ;;  %v879_v43 = vpack.c.bf16 %v864_v10, %v863_v30  ;;  %v823_v19 = vadd.f32 1.0, %v1817_v3 }
 0x2ef   :  { %v1821_v45 = vpop.eup %1820  ;;  %1838 = vrcp.f32 %v825_v38  ;;  %v826_v8 = vadd.f32 1.0, %v1819_v41 }
 0x2f0   :  { %v1823_v16 = vpop.eup %1822  ;;  %1840 = vrcp.f32 %v823_v19  ;;  %v824_v47 = vadd.f32 1.0, %v1821_v45  ;;  %1558 = vmatprep.mubr.msk.bf16.mxu1 %vm381_vm3, %v879_v43 }
 0x2f1   :  { %v1825_v14 = vpop.eup %1824  ;;  %1842 = vrcp.f32 %v826_v8  ;;  %1559 = vmatmul.mubr.msk.bf16.vlgmr.msra.gmra.mrb[24].mxu1 %vm381_vm3, %v880_v37  ;;  %v869_v25 = vmul.f32 %v1823_v16, %v2243_v34 }
 0x2f2   :  { %v1827_v44 = vpop.eup %1826  ;;  %1844 = vrcp.f32 %v824_v47  ;;  %v867_v51 = vmul.f32 %v1825_v14, %v2246_v36 }
 0x2f3   :  { %v1829_v23 = vpop.eup %1828  ;;  %v870_v48 = vmul.f32 %v1827_v44, %v2250_v39 }
 0x2f4   :  { %v1831_v49 = vpop.eup %1830  ;;  %v868_v18 = vmul.f32 %v1829_v23, %v2254_v12 }
 0x2f5   :  { %v1833_v52 = vpop.eup %1832  ;;  %v882_v22 = vpack.c.bf16 %v870_v48, %v869_v25  ;;  %v829_v55 = vadd.f32 1.0, %v1831_v49 }
 0x2f6   :  { %v1835_v56 = vpop.eup %1834  ;;  %v881_v58 = vpack.c.bf16 %v868_v18, %v867_v51  ;;  %v827_v29 = vadd.f32 1.0, %v1833_v52 }
 0x2f7   :  { %v1837_v60 = vpop.eup %1836  ;;  %1846 = vrcp.f32 %v829_v55  ;;  %v830_v35 = vadd.f32 1.0, %v1835_v56 }
 0x2f8   :  { %1848 = vrcp.f32 %v827_v29  ;;  %v828_v15 = vadd.f32 1.0, %v1837_v60  ;;  %1562 = vmatprep.mubr.msk.bf16.mxu1 %vm381_vm3, %v881_v58 }
 0x2f9   :  { %v1839_v34 = vpop.eup %1838  ;;  %1850 = vrcp.f32 %v830_v35  ;;  %1563 = vmatmul.mubr.msk.bf16.gmra.mrb[28].mxu1 %vm381_vm3, %v882_v22 }
 0x2fa   :  { %v1841_v36 = vpop.eup %1840  ;;  %1852 = vrcp.f32 %v828_v15  ;;  %v873_v40 = vmul.f32 %v1839_v34, %v2259_v53 }
 0x2fb   :  { %v1843_v39 = vpop.eup %1842  ;;  %v871_v61 = vmul.f32 %v1841_v36, %v2262_v20 }
 0x2fc   :  { %v1845_v12 = vpop.eup %1844  ;;  %v874_v33 = vmul.f32 %v1843_v39, %v2266_v24 }
 0x2fd   :  { %v872_v62 = vmul.f32 %v1845_v12, %v2270_v31 }
 0x2fe   :  { %v884_v63 = vpack.c.bf16 %v874_v33, %v873_v40 }
 0x2ff   :  { %v883_v0 = vpack.c.bf16 %v872_v62, %v871_v61 }
 0x301   :  { %v1847_v1 = vpop.eup %1846  ;;  %1566 = vmatprep.mubr.msk.bf16.mxu1 %vm381_vm3, %v883_v0 }
 0x302   :  { %v1849_v2 = vpop.eup %1848  ;;  %1567 = vmatmul.mubr.msk.bf16.gmra.mrb[32].mxu1 %vm381_vm3, %v884_v63  ;;  %v877_v27 = vmul.f32 %v1847_v1, %v2275_v42  ;;  %v2319_v42 = vld [vmem:[%s2458_s9] ss:$0 sm:$0xff] }
 0x303   :  { %v1851_v50 = vpop.eup %1850  ;;  %v875_v24 = vmul.f32 %v1849_v2, %v2278_v4 }
 0x304   :  { %v1853_v54 = vpop.eup %1852  ;;  %v878_v53 = vmul.f32 %v1851_v50, %v2282_v5 }
 0x305   :  { %v876_v20 = vmul.f32 %v1853_v54, %v2286_v7 }
 0x306   :  { %v886_v57 = vpack.c.bf16 %v878_v53, %v877_v27 }
 0x307   :  { %v885_v31 = vpack.c.bf16 %v876_v20, %v875_v24 }
 0x309   :  { %1570 = vmatprep.mubr.msk.bf16.mxu1 %vm381_vm3, %v885_v31 }
 0x30a   :  { %1571 = vmatmul.mubr.msk.bf16.gmra.mrb[36].mxu1 %vm381_vm3, %v886_v57 }
 0x3c4   :  { %v1560_v4 = vpop.f32.mrb[24].mxu1 }
 0x3c5   :  { %v2322_v5 = vadd.f32 %v1560_v4, %v2319_v42  ;;  %v968_v6 = vpop.f32.mrb[25].mxu1 }
 0x3c6   :  { %v2325_v46 = vadd.f32 %v2319_v42, %v968_v6  ;;  %v1561_v7 = vpop.f32.mrb[26].mxu1 }
 0x3c7   :  { %v1404_v9 = vmul.f32 -1.442695, %v2322_v5  ;;  %v2329_v11 = vadd.f32 %v1561_v7, %v2319_v42  ;;  %v971_v13 = vpop.f32.mrb[27].mxu1 }
 0x3c8   :  { %v1402_v17 = vmul.f32 -1.442695, %v2325_v46  ;;  %v2333_v21 = vadd.f32 %v2319_v42, %v971_v13 }
 0x3c9   :  { %1854 = vpow2.f32 %v1404_v9  ;;  %v1405_v26 = vmul.f32 -1.442695, %v2329_v11 }
 0x3ca   :  { %1856 = vpow2.f32 %v1402_v17  ;;  %v1403_v28 = vmul.f32 -1.442695, %v2333_v21 }
 0x3cb   :  { %1858 = vpow2.f32 %v1405_v26 }
 0x3cc   :  { %1860 = vpow2.f32 %v1403_v28  ;;  %v1564_v30 = vpop.f32.mrb[28].mxu1 }
 0x3cd   :  { %v2338_v10 = vadd.f32 %v1564_v30, %v2319_v42  ;;  %v984_v3 = vpop.f32.mrb[29].mxu1 }
 0x3ce   :  { %v2341_v37 = vadd.f32 %v2319_v42, %v984_v3  ;;  %v1565_v38 = vpop.f32.mrb[30].mxu1 }
 0x3cf   :  { %v1408_v41 = vmul.f32 -1.442695, %v2338_v10  ;;  %v2345_v43 = vadd.f32 %v1565_v38, %v2319_v42  ;;  %v987_v19 = vpop.f32.mrb[31].mxu1 }
 0x3d0   :  { %v1406_v45 = vmul.f32 -1.442695, %v2341_v37  ;;  %v2349_v8 = vadd.f32 %v2319_v42, %v987_v19 }
 0x3d1   :  { %1862 = vpow2.f32 %v1408_v41  ;;  %v1409_v16 = vmul.f32 -1.442695, %v2345_v43 }
 0x3d2   :  { %1864 = vpow2.f32 %v1406_v45  ;;  %v1407_v47 = vmul.f32 -1.442695, %v2349_v8 }
 0x3d3   :  { %v1855_v14 = vpop.eup %1854  ;;  %1866 = vpow2.f32 %v1409_v16 }
 0x3d4   :  { %v1857_v44 = vpop.eup %1856  ;;  %v1081_v23 = vadd.f32 1.0, %v1855_v14  ;;  %1868 = vpow2.f32 %v1407_v47 }
 0x3d5   :  { %v1859_v25 = vpop.eup %1858  ;;  %v1079_v48 = vadd.f32 1.0, %v1857_v44  ;;  %v1568_v49 = vpop.f32.mrb[32].mxu1 }
 0x3d6   :  { %v1861_v51 = vpop.eup %1860  ;;  %1870 = vrcp.f32 %v1081_v23  ;;  %v1082_v18 = vadd.f32 1.0, %v1859_v25  ;;  %v2354_v52 = vadd.f32 %v1568_v49, %v2319_v42  ;;  %v1000_v22 = vpop.f32.mrb[33].mxu1 }
 0x3d7   :  { %1872 = vrcp.f32 %v1079_v48  ;;  %v1080_v55 = vadd.f32 1.0, %v1861_v51  ;;  %v2357_v56 = vadd.f32 %v2319_v42, %v1000_v22  ;;  %v1569_v58 = vpop.f32.mrb[34].mxu1 }
 0x3d8   :  { %1874 = vrcp.f32 %v1082_v18  ;;  %v1412_v29 = vmul.f32 -1.442695, %v2354_v52  ;;  %v2361_v60 = vadd.f32 %v1569_v58, %v2319_v42  ;;  %v1003_v35 = vpop.f32.mrb[35].mxu1 }
 0x3d9   :  { %1876 = vrcp.f32 %v1080_v55  ;;  %v1410_v15 = vmul.f32 -1.442695, %v2357_v56  ;;  %v2365_v34 = vadd.f32 %v2319_v42, %v1003_v35 }
 0x3da   :  { %1878 = vpow2.f32 %v1412_v29  ;;  %v1413_v36 = vmul.f32 -1.442695, %v2361_v60 }
 0x3db   :  { %v1863_v39 = vpop.eup %1862  ;;  %1880 = vpow2.f32 %v1410_v15  ;;  %v1411_v12 = vmul.f32 -1.442695, %v2365_v34 }
 0x3dc   :  { %v1865_v40 = vpop.eup %1864  ;;  %v1085_v33 = vadd.f32 1.0, %v1863_v39  ;;  %1882 = vpow2.f32 %v1413_v36 }
 0x3dd   :  { %v1867_v61 = vpop.eup %1866  ;;  %v1083_v62 = vadd.f32 1.0, %v1865_v40  ;;  %1884 = vpow2.f32 %v1411_v12  ;;  %v1572_v63 = vpop.f32.mrb[36].mxu1 }
 0x3de   :  { %v1869_v0 = vpop.eup %1868  ;;  %1886 = vrcp.f32 %v1085_v33  ;;  %v1086_v1 = vadd.f32 1.0, %v1867_v61  ;;  %v2370_v2 = vadd.f32 %v1572_v63, %v2319_v42  ;;  %v1016_v50 = vpop.f32.mrb[37].mxu1 }
 0x3df   :  { %1888 = vrcp.f32 %v1083_v62  ;;  %v1084_v54 = vadd.f32 1.0, %v1869_v0  ;;  %v2373_v27 = vadd.f32 %v2319_v42, %v1016_v50  ;;  %v1573_v53 = vpop.f32.mrb[38].mxu1 }
 0x3e0   :  { %v1871_v24 = vpop.eup %1870  ;;  %1890 = vrcp.f32 %v1086_v1  ;;  %v1416_v20 = vmul.f32 -1.442695, %v2370_v2  ;;  %v2377_v57 = vadd.f32 %v1573_v53, %v2319_v42  ;;  %v1019_v31 = vpop.f32.mrb[39].mxu1 }
 0x3e1   :  { %v1873_v4 = vpop.eup %1872  ;;  %1892 = vrcp.f32 %v1084_v54  ;;  %v1414_v6 = vmul.f32 -1.442695, %v2373_v27  ;;  %v2381_v7 = vadd.f32 %v2319_v42, %v1019_v31  ;;  %v1129_v26 = vmul.f32 %v1871_v24, %v2322_v5 }
 0x3e2   :  { %v1875_v9 = vpop.eup %1874  ;;  %1894 = vpow2.f32 %v1416_v20  ;;  %v1417_v13 = vmul.f32 -1.442695, %v2377_v57  ;;  %v1127_v38 = vmul.f32 %v1873_v4, %v2325_v46 }
 0x3e3   :  { %v1877_v17 = vpop.eup %1876  ;;  %v1130_v28 = vmul.f32 %v1875_v9, %v2329_v11  ;;  %1896 = vpow2.f32 %v1414_v6  ;;  %v1415_v30 = vmul.f32 -1.442695, %v2381_v7 }
 0x3e4   :  { %v1879_v3 = vpop.eup %1878  ;;  %v1128_v41 = vmul.f32 %v1877_v17, %v2333_v21  ;;  %1898 = vpow2.f32 %v1417_v13  ;;  %v1274_v13 = vld [vmem:[%s2460_s1] sm:$0xff] }
 0x3e5   :  { %v1881_v42 = vpop.eup %1880  ;;  %v1614_v19 = vpack.c.bf16 %v1130_v28, %v1129_v26  ;;  %v1089_v45 = vadd.f32 1.0, %v1879_v3  ;;  %1900 = vpow2.f32 %v1415_v30 }
 0x3e6   :  { %v1883_v5 = vpop.eup %1882  ;;  %v1610_v11 = vpack.c.bf16 %v1128_v41, %v1127_v38  ;;  %v1087_v47 = vadd.f32 1.0, %v1881_v42  ;;  %v1296_v42 = vld [vmem:[%s2461_s11 + $0x4] sm:$0x1] }
 0x3e7   :  { %v1885_v14 = vpop.eup %1884  ;;  %1902 = vrcp.f32 %v1089_v45  ;;  %v1090_v44 = vadd.f32 1.0, %v1883_v5 }
 0x3e8   :  { %v1887_v46 = vpop.eup %1886  ;;  %1904 = vrcp.f32 %v1087_v47  ;;  %v1088_v21 = vadd.f32 1.0, %v1885_v14  ;;  %1612 = vmatpush3.bf16.xpose.msk.msra.mxu0 %vm2391_vm5, %v1610_v11 }
 0x3e9   :  { %v1889_v23 = vpop.eup %1888  ;;  %1906 = vrcp.f32 %v1090_v44  ;;  %1613 = vmatprep.subr.bf16.mxu0 %v1919_v32  ;;  %v1133_v49 = vmul.f32 %v1887_v46, %v2338_v10 }
 0x3ea   :  { %v1891_v25 = vpop.eup %1890  ;;  %1908 = vrcp.f32 %v1088_v21  ;;  %v1131_v22 = vmul.f32 %v1889_v23, %v2341_v37 }
 0x3eb   :  { %v1893_v48 = vpop.eup %1892  ;;  %v1134_v51 = vmul.f32 %v1891_v25, %v2345_v43 }
 0x3ec   :  { %v1895_v18 = vpop.eup %1894  ;;  %v1132_v55 = vmul.f32 %v1893_v48, %v2349_v8 }
 0x3ed   :  { %v1897_v58 = vpop.eup %1896  ;;  %v1622_v29 = vpack.c.bf16 %v1134_v51, %v1133_v49  ;;  %v1093_v35 = vadd.f32 1.0, %v1895_v18 }
 0x3ee   :  { %v1899_v15 = vpop.eup %1898  ;;  %v1618_v36 = vpack.c.bf16 %v1132_v55, %v1131_v22  ;;  %v1091_v39 = vadd.f32 1.0, %v1897_v58 }
 0x3ef   :  { %v1901_v12 = vpop.eup %1900  ;;  %1910 = vrcp.f32 %v1093_v35  ;;  %v1094_v40 = vadd.f32 1.0, %v1899_v15 }
 0x3f0   :  { %1912 = vrcp.f32 %v1091_v39  ;;  %v1092_v33 = vadd.f32 1.0, %v1901_v12  ;;  %1616 = vmatpush3.bf16.xpose.msk.msra.mxu0 %vm2391_vm5, %v1614_v19 }
 0x3f1   :  { %v1903_v10 = vpop.eup %1902  ;;  %1914 = vrcp.f32 %v1094_v40  ;;  %1617 = vmatprep.subr.bf16.mxu0 %v1919_v32 }
 0x3f2   :  { %v1905_v37 = vpop.eup %1904  ;;  %1916 = vrcp.f32 %v1092_v33  ;;  %v1137_v61 = vmul.f32 %v1903_v10, %v2354_v52 }
 0x3f3   :  { %v1907_v43 = vpop.eup %1906  ;;  %v1135_v63 = vmul.f32 %v1905_v37, %v2357_v56 }
 0x3f4   :  { %v1909_v8 = vpop.eup %1908  ;;  %v1138_v62 = vmul.f32 %v1907_v43, %v2361_v60 }
 0x3f5   :  { %v1136_v0 = vmul.f32 %v1909_v8, %v2365_v34 }
 0x3f6   :  { %v1630_v1 = vpack.c.bf16 %v1138_v62, %v1137_v61 }
 0x3f7   :  { %v1626_v50 = vpack.c.bf16 %v1136_v0, %v1135_v63 }
 0x3f8   :  { %1620 = vmatpush3.bf16.xpose.msk.msra.mxu0 %vm2391_vm5, %v1618_v36 }
 0x3f9   :  { %v1911_v54 = vpop.eup %1910  ;;  %1621 = vmatprep.subr.bf16.mxu0 %v1919_v32 }
 0x3fa   :  { %v1913_v53 = vpop.eup %1912  ;;  %v1141_v31 = vmul.f32 %v1911_v54, %v2370_v2  ;;  %v1143_v2 = vld [vmem:[%s2459_s10] sm:$0x1] }
 0x3fb   :  { %v1915_v24 = vpop.eup %1914  ;;  %v1139_v60 = vmul.f32 %v1913_v53, %v2373_v27  ;;  %v1265_v27 = vlaneseq }
 0x3fc   :  { %v1917_v20 = vpop.eup %1916  ;;  %v1142_v52 = vmul.f32 %v1915_v24, %v2377_v57 }
 0x3fd   :  { %v1140_v56 = vmul.f32 %v1917_v20, %v2381_v7  ;;  %v1266_v57 = vshrl.u32 %v1265_v27, 7 }
 0x3fe   :  { %v1638_v34 = vpack.c.bf16 %v1142_v52, %v1141_v31 }
 0x3ff   :  { %v1634_v4 = vpack.c.bf16 %v1140_v56, %v1139_v60  ;;  %v1267_v6 = vadd.s32 8, %v1266_v57  ;;  %v1278_v7 = vsub.s32 0, %v1266_v57 }
 0x400   :  { %1624 = vmatpush3.bf16.xpose.msk.msra.mxu0 %vm2391_vm5, %v1622_v29 }
 0x401   :  { %1625 = vmatprep.subr.bf16.mxu0 %v1919_v32  ;;  %vm1269_vm6 = vcmp.eq.s32.totalorder %v1267_v6, 8 }
 0x402   :  { %v1435_v28 = vsel %vm1269_vm6, 1.0, %v1921_v59 }
 0x408   :  { %1628 = vmatpush3.bf16.xpose.msk.msra.mxu0 %vm2391_vm5, %v1626_v50 }
 0x409   :  { %1629 = vmatprep.subr.bf16.mxu0 %v1919_v32 }
 0x410   :  { %1632 = vmatpush3.bf16.xpose.msk.msra.mxu0 %vm2391_vm5, %v1630_v1 }
 0x411   :  { %1633 = vmatprep.subr.bf16.mxu0 %v1919_v32 }
 0x418   :  { %1636 = vmatpush3.bf16.xpose.msk.msra.mxu0 %vm2391_vm5, %v1634_v4 }
 0x419   :  { %1637 = vmatprep.subr.bf16.mxu0 %v1919_v32  ;;  %v1275_v32 = vld [vmem:[%s2460_s1 + $0x8] sm:$0x1] }
 0x420   :  { %1640 = vmatpush3.bf16.xpose.msk.msra.mxu0 %vm2391_vm5, %v1638_v34 }
 0x427   :  { %1607 = vmatmul.mubr.msk.f32.vlgmr.msra.gmra.mrb[24].mxu0 %vm381_vm3, %v1143_v2 }
 0x4fa   :  { %v1261_v9 = vpop.f32.mrb[24].mxu0 }
 0x4fb   :  { %v1279_v17 = vrot.slane %v1261_v9, %v1278_v7  ;;  %v1608_v26 = vpop.f32.mrb[25].mxu0 }
 0x4fd   :  { %v1280_v30 = vmul.f32 %v1279_v17, %v1274_v13  ;;  %v1281_v3 = vmul.f32 %v1279_v17, %v1275_v32 }
 0x4ff   :  { %v1283_v38 = vadd.f32 %v1435_v28, %v1281_v3  ;;  %v1438_v41 = vpack.c.bf16 %v1280_v30, %v1280_v30 }
 0x501   :  { %v1439_v19 = vpack.c.bf16 %v1283_v38, %v1283_v38  ;;  %1292 = vst [vmem:[%s2461_s11] sm:$0xf] %v1438_v41 }
 0x503   :  { %v1297_v45 = vsel %vm1295_vm9, %v1439_v19, %v1296_v42 }
 0x504   :  { %1298 = vst [vmem:[%s2461_s11 + $0x4] sm:$0x1] %v1297_v45 }

</bundles_post_ra>
